<compile_context>
chip_gen: v7x
topology: tpu7x:2x2x1
jax: 0.10.0
libtpu: 0.0.40
codegen_flags: <defaults>
</compile_context>

<pallas_src>
import functools

import jax
import jax.numpy as jnp
from jax.experimental import pallas as pl
from jax.experimental.pallas import tpu as pltpu


def _robust_kernel(res_ref, wprev_ref, we_ref, wu_ref, wm_ref, be_ref, bum_ref,
                   out_ref):
    """One row-tile of the fused forward:
         wtemp = sigmoid(residual @ We + be)
         out   = relu(wtemp @ Wu + wprev @ Wm + (bu + bm))
    Inputs arrive f32 and are cast to bf16 on-chip; accumulation is f32.
    """
    cd = we_ref.dtype  # compute (MXU) dtype, bf16

    # E-step: sigmoid(Linear(residual))
    h = jnp.dot(res_ref[...].astype(cd), we_ref[...],
                preferred_element_type=jnp.float32)
    wtemp = jax.nn.sigmoid(h + be_ref[...])

    # Update + memory: two dots into one f32 accumulator (no concat copy;
    # the wprev @ Wm pass can overlap the EUP sigmoid above).
    y = jnp.dot(wtemp.astype(cd), wu_ref[...],
                preferred_element_type=jnp.float32)
    y = y + jnp.dot(wprev_ref[...].astype(cd), wm_ref[...],
                    preferred_element_type=jnp.float32)
    y = y + bum_ref[...]

    out_ref[...] = jnp.maximum(y, 0.0).astype(out_ref.dtype)


_CANDIDATE_ROWS = (2048, 1024, 512, 256, 128, 64, 32, 16, 8)


def _chip_info():
    """(num_tensorcores, scoped_vmem_cap_bytes) for the current TPU generation."""
    try:
        kind = jax.devices()[0].device_kind.lower()
    except Exception:
        kind = ""
    if "v7" in kind:
        return 2, 48 << 20          # 2 TCs/chip, 64 MiB VMEM/TC -> cap ~48 MiB
    if "v6" in kind or "v5" in kind:
        return 1, 100 << 20         # 1 TC/chip, 128 MiB VMEM -> cap ~100 MiB
    return 2, 48 << 20              # unknown generation: conservative defaults


def _pick_block_rows(batch, fits, want_even_steps):
    """Largest row tile that divides batch and fits the VMEM budget.
    On multi-TC chips (v7x) prefer an even number of >=2 grid steps so the
    'parallel' axis splits evenly across TensorCores."""
    if want_even_steps:
        for cand in _CANDIDATE_ROWS:
            steps = batch // cand
            if batch % cand == 0 and steps >= 2 and steps % 2 == 0 and fits(cand):
                return cand
    for cand in _CANDIDATE_ROWS:
        if batch % cand == 0 and fits(cand):
            return cand
    return batch  # tiny / odd batch: single grid step covering everything


def prepare_params(params, compute_dtype=jnp.bfloat16):
    """One-time weight prep (transpose / cast / bias pre-sum).
    Call once outside the hot path; pass the result to robust_layer()."""
    return {
        "we_t": jnp.asarray(params["estep_w"]).T.astype(compute_dtype),   # (nvis, nvis)
        "wu_t": jnp.asarray(params["update_w"]).T.astype(compute_dtype),  # (nvis, nvis)
        "wm_t": jnp.asarray(params["memory_w"]).T.astype(compute_dtype),  # (nvis, nvis)
        "be": jnp.asarray(params["estep_b"], jnp.float32).reshape(1, -1),
        "bum": (jnp.asarray(params["update_b"], jnp.float32)
                + jnp.asarray(params["memory_b"], jnp.float32)).reshape(1, -1),
    }


@functools.partial(jax.jit, static_argnames=("block_rows", "out_dtype"))
def robust_layer(residual, wprev, prepped, block_rows=None, out_dtype=None):
    """Fused RobustLayer forward.  `prepped` is the output of prepare_params()."""
    B, nvis = residual.shape
    assert wprev.shape == (B, nvis)
    assert prepped["we_t"].shape == (nvis, nvis)

    out_dtype = residual.dtype if out_dtype is None else out_dtype
    csize = jnp.dtype(prepped["we_t"].dtype).itemsize
    in_size = jnp.dtype(residual.dtype).itemsize
    out_size = jnp.dtype(out_dtype).itemsize

    num_cores, vmem_cap = _chip_info()

    # Resident, grid-invariant operands (single-buffered): 3 weights + 2 biases.
    weight_bytes = 3 * nvis * nvis * csize + 2 * nvis * 4

    def tile_bytes(rows):
        return (2 * 2 * rows * nvis * in_size   # residual + wprev tiles, double-buffered
                + 2 * rows * nvis * out_size    # output tile, double-buffered
                + 2 * rows * nvis * csize       # on-chip bf16 casts of the two inputs
                + 4 * rows * nvis * 4)          # f32 intermediates / headroom

    pick_budget = vmem_cap - (8 << 20)
    if block_rows is None:
        block_rows = _pick_block_rows(
            B,
            fits=lambda r: weight_bytes + tile_bytes(r) <= pick_budget,
            want_even_steps=(num_cores > 1))
    assert B % block_rows == 0
    assert block_rows % 8 == 0 or block_rows == B

    grid = (B // block_rows,)

    row_spec = pl.BlockSpec((block_rows, nvis), lambda i: (i, 0))
    # Grid-invariant operands: constant index_map => safe to single-buffer.
    const = lambda shape: pl.BlockSpec(shape, lambda i: (0, 0),
                                       pipeline_mode=pl.Buffered(1))

    vmem_limit = int(min(max(weight_bytes + tile_bytes(block_rows) + (8 << 20),
                             32 << 20),
                         vmem_cap))

    cost = pl.CostEstimate(
        flops=6 * B * nvis * nvis,                 # three B x nvis x nvis matmuls
        transcendentals=B * nvis,                  # sigmoid
        bytes_accessed=(2 * B * nvis * in_size     # residual + wprev reads
                        + B * nvis * out_size      # output write
                        + 3 * nvis * nvis * csize  # weights
                        + 2 * nvis * 4),           # biases
    )

    return pl.pallas_call(
        _robust_kernel,
        out_shape=jax.ShapeDtypeStruct((B, nvis), out_dtype),
        grid_spec=pltpu.PrefetchScalarGridSpec(
            num_scalar_prefetch=0,
            grid=grid,
            in_specs=[row_spec, row_spec,
                      const((nvis, nvis)), const((nvis, nvis)), const((nvis, nvis)),
                      const((1, nvis)), const((1, nvis))],
            out_specs=row_spec,
        ),
        compiler_params=pltpu.CompilerParams(
            dimension_semantics=("parallel",),
            vmem_limit_bytes=vmem_limit),
        cost_estimate=cost,
    )(residual, wprev, prepped["we_t"], prepped["wu_t"], prepped["wm_t"],
      prepped["be"], prepped["bum"])


def _init_params(key, nvis):
    """Deterministic init mimicking nn.Linear default (uniform +-1/sqrt(fan_in))."""
    bound = 1.0 / jnp.sqrt(nvis)
    ks = jax.random.split(key, 6)
    u = lambda k, shape: jax.random.uniform(k, shape, jnp.float32, -bound, bound)
    return {
        "estep_w": u(ks[0], (nvis, nvis)),  "estep_b": u(ks[1], (nvis,)),
        "update_w": u(ks[2], (nvis, nvis)), "update_b": u(ks[3], (nvis,)),
        "memory_w": u(ks[4], (nvis, nvis)), "memory_b": u(ks[5], (nvis,)),
    }


def _reference(residual, wprev, p):
    """Exact f32 math, matches the PyTorch module."""
    wtemp = jax.nn.sigmoid(residual @ p["estep_w"].T + p["estep_b"])
    return jax.nn.relu(wtemp @ p["update_w"].T + p["update_b"]
                       + wprev @ p["memory_w"].T + p["memory_b"])


def _reference_bf16(residual, wprev, p):
    """Same quantization as the kernel: bf16 MXU operands, f32 accumulation."""
    cd = jnp.bfloat16

    def mm(x, w):
        return jnp.dot(x.astype(cd), w.T.astype(cd),
                       preferred_element_type=jnp.float32)

    wtemp = jax.nn.sigmoid(mm(residual, p["estep_w"]) + p["estep_b"])
    return jax.nn.relu(mm(wtemp, p["update_w"]) + p["update_b"]
                       + mm(wprev, p["memory_w"]) + p["memory_b"])


if __name__ == "__main__":
    B, NVIS = 256, 256   # small shapes; multiples of (8, 128) for clean tiling
    key = jax.random.PRNGKey(0)
    k_res, k_wp, k_par = jax.random.split(key, 3)

    residual = jax.random.normal(k_res, (B, NVIS), jnp.float32)
    wprev = jax.random.normal(k_wp, (B, NVIS), jnp.float32)
    params = _init_params(k_par, NVIS)

    # One-time weight prep, hoisted out of the hot path.
    prepped = jax.block_until_ready(prepare_params(params))

    out = jax.block_until_ready(robust_layer(residual, wprev, prepped))
    assert out.shape == (B, NVIS)
    assert out.dtype == residual.dtype

    # Tight check vs a reference using the same bf16-operand / f32-accumulate math.
    ref_q = _reference_bf16(residual, wprev, params)
    assert jnp.allclose(out, ref_q, atol=2e-3, rtol=2e-3), "mismatch vs bf16 reference"

    # Loose sanity check vs exact f32 math (bf16 operands introduce ~1e-2 level error).
    ref = _reference(residual, wprev, params)
    assert jnp.allclose(out, ref, atol=1e-1, rtol=1e-1), "mismatch vs f32 reference"

    print("KERNEL_OK")
</pallas_src>

<mosaic_0001>
module attributes {stable_mosaic.version = 11 : i64} {
  func.func @_robust_kernel(%arg0: i32, %arg1: memref<128x256xf32, #tpu.memory_space<vmem>>, %arg2: memref<128x256xf32, #tpu.memory_space<vmem>>, %arg3: memref<256x256xbf16, #tpu.memory_space<vmem>>, %arg4: memref<256x256xbf16, #tpu.memory_space<vmem>>, %arg5: memref<256x256xbf16, #tpu.memory_space<vmem>>, %arg6: memref<1x256xf32, #tpu.memory_space<vmem>>, %arg7: memref<1x256xf32, #tpu.memory_space<vmem>>, %arg8: memref<128x256xf32, #tpu.memory_space<vmem>>) attributes {dimension_semantics = [#tpu.dimension_semantics<parallel>], iteration_bounds = array<i64: 2>, scalar_prefetch = 0 : i64, scratch_operands = 0 : i64, tpu.core_type = #tpu.core_type<tc>, window_params = [{transform_indices = @transform_0, window_bounds = array<i64: 128, 256>}, {transform_indices = @transform_1, window_bounds = array<i64: 128, 256>}, {pipeline_mode = #tpu.pipeline_mode<synchronous>, transform_indices = @transform_2, window_bounds = array<i64: 256, 256>}, {pipeline_mode = #tpu.pipeline_mode<synchronous>, transform_indices = @transform_3, window_bounds = array<i64: 256, 256>}, {pipeline_mode = #tpu.pipeline_mode<synchronous>, transform_indices = @transform_4, window_bounds = array<i64: 256, 256>}, {pipeline_mode = #tpu.pipeline_mode<synchronous>, transform_indices = @transform_5, window_bounds = array<i64: 1, 256>}, {pipeline_mode = #tpu.pipeline_mode<synchronous>, transform_indices = @transform_6, window_bounds = array<i64: 1, 256>}, {transform_indices = @transform_7, window_bounds = array<i64: 128, 256>}]} {
    %c0 = arith.constant 0 : index
    %c0_0 = arith.constant 0 : index
    %0 = vector.load %arg1[%c0, %c0_0] : memref<128x256xf32, #tpu.memory_space<vmem>>, vector<128x256xf32>
    %1 = arith.truncf %0 : vector<128x256xf32> to vector<128x256xbf16>
    %c0_1 = arith.constant 0 : index
    %c0_2 = arith.constant 0 : index
    %2 = vector.load %arg3[%c0_1, %c0_2] : memref<256x256xbf16, #tpu.memory_space<vmem>>, vector<256x256xbf16>
    %cst = arith.constant dense<0.000000e+00> : vector<128x256xf32>
    %3 = tpu.matmul %1, %2, %cst {dimension_numbers = #tpu.dot_dimension_numbers<[1], [0], [0], [1], [0, 0, 1, 1], [], []>} : vector<128x256xbf16>, vector<256x256xbf16>, vector<128x256xf32> -> vector<128x256xf32>
    %c0_3 = arith.constant 0 : index
    %c0_4 = arith.constant 0 : index
    %4 = vector.load %arg6[%c0_3, %c0_4] : memref<1x256xf32, #tpu.memory_space<vmem>>, vector<1x256xf32>
    %5 = vector.broadcast %4 : vector<1x256xf32> to vector<128x256xf32>
    %6 = arith.addf %3, %5 : vector<128x256xf32>
    %7 = arith.negf %6 : vector<128x256xf32>
    %8 = math.exp %7 : vector<128x256xf32>
    %cst_5 = arith.constant 1.000000e+00 : f32
    %9 = vector.broadcast %cst_5 : f32 to vector<128x256xf32>
    %10 = arith.addf %9, %8 : vector<128x256xf32>
    %11 = arith.divf %9, %10 : vector<128x256xf32>
    %12 = arith.truncf %11 : vector<128x256xf32> to vector<128x256xbf16>
    %c0_6 = arith.constant 0 : index
    %c0_7 = arith.constant 0 : index
    %13 = vector.load %arg4[%c0_6, %c0_7] : memref<256x256xbf16, #tpu.memory_space<vmem>>, vector<256x256xbf16>
    %cst_8 = arith.constant dense<0.000000e+00> : vector<128x256xf32>
    %14 = tpu.matmul %12, %13, %cst_8 {dimension_numbers = #tpu.dot_dimension_numbers<[1], [0], [0], [1], [0, 0, 1, 1], [], []>} : vector<128x256xbf16>, vector<256x256xbf16>, vector<128x256xf32> -> vector<128x256xf32>
    %c0_9 = arith.constant 0 : index
    %c0_10 = arith.constant 0 : index
    %15 = vector.load %arg2[%c0_9, %c0_10] : memref<128x256xf32, #tpu.memory_space<vmem>>, vector<128x256xf32>
    %16 = arith.truncf %15 : vector<128x256xf32> to vector<128x256xbf16>
    %c0_11 = arith.constant 0 : index
    %c0_12 = arith.constant 0 : index
    %17 = vector.load %arg5[%c0_11, %c0_12] : memref<256x256xbf16, #tpu.memory_space<vmem>>, vector<256x256xbf16>
    %cst_13 = arith.constant dense<0.000000e+00> : vector<128x256xf32>
    %18 = tpu.matmul %16, %17, %cst_13 {dimension_numbers = #tpu.dot_dimension_numbers<[1], [0], [0], [1], [0, 0, 1, 1], [], []>} : vector<128x256xbf16>, vector<256x256xbf16>, vector<128x256xf32> -> vector<128x256xf32>
    %19 = arith.addf %14, %18 : vector<128x256xf32>
    %c0_14 = arith.constant 0 : index
    %c0_15 = arith.constant 0 : index
    %20 = vector.load %arg7[%c0_14, %c0_15] : memref<1x256xf32, #tpu.memory_space<vmem>>, vector<1x256xf32>
    %21 = vector.broadcast %20 : vector<1x256xf32> to vector<128x256xf32>
    %22 = arith.addf %19, %21 : vector<128x256xf32>
    %cst_16 = arith.constant 0.000000e+00 : f32
    %23 = vector.broadcast %cst_16 : f32 to vector<128x256xf32>
    %24 = arith.maximumf %22, %23 : vector<128x256xf32>
    %c0_17 = arith.constant 0 : index
    %c0_18 = arith.constant 0 : index
    %25 = vector.load %arg8[%c0_17, %c0_18] : memref<128x256xf32, #tpu.memory_space<vmem>>, vector<128x256xf32>
    tpu.vector_store %arg8[%c0_17, %c0_18], %24 {strides = array<i32>} : memref<128x256xf32, #tpu.memory_space<vmem>>, vector<128x256xf32>,
    return
  }
  func.func @transform_0(%arg0: i32) -> (i32, i32) {
    %c0_i32 = arith.constant 0 : i32
    %c0_i32_0 = arith.constant 0 : i32
    return %arg0, %c0_i32 : i32, i32
  }
  func.func @transform_1(%arg0: i32) -> (i32, i32) {
    %c0_i32 = arith.constant 0 : i32
    %c0_i32_0 = arith.constant 0 : i32
    return %arg0, %c0_i32 : i32, i32
  }
  func.func @transform_2(%arg0: i32) -> (i32, i32) {
    %c0_i32 = arith.constant 0 : i32
    %c0_i32_0 = arith.constant 0 : i32
    %c0_i32_1 = arith.constant 0 : i32
    return %c0_i32, %c0_i32_0 : i32, i32
  }
  func.func @transform_3(%arg0: i32) -> (i32, i32) {
    %c0_i32 = arith.constant 0 : i32
    %c0_i32_0 = arith.constant 0 : i32
    %c0_i32_1 = arith.constant 0 : i32
    return %c0_i32, %c0_i32_0 : i32, i32
  }
  func.func @transform_4(%arg0: i32) -> (i32, i32) {
    %c0_i32 = arith.constant 0 : i32
    %c0_i32_0 = arith.constant 0 : i32
    %c0_i32_1 = arith.constant 0 : i32
    return %c0_i32, %c0_i32_0 : i32, i32
  }
  func.func @transform_5(%arg0: i32) -> (i32, i32) {
    %c0_i32 = arith.constant 0 : i32
    %c0_i32_0 = arith.constant 0 : i32
    %c0_i32_1 = arith.constant 0 : i32
    return %c0_i32, %c0_i32_0 : i32, i32
  }
  func.func @transform_6(%arg0: i32) -> (i32, i32) {
    %c0_i32 = arith.constant 0 : i32
    %c0_i32_0 = arith.constant 0 : i32
    %c0_i32_1 = arith.constant 0 : i32
    return %c0_i32, %c0_i32_0 : i32, i32
  }
  func.func @transform_7(%arg0: i32) -> (i32, i32) {
    %c0_i32 = arith.constant 0 : i32
    %c0_i32_0 = arith.constant 0 : i32
    return %arg0, %c0_i32 : i32, i32
  }
}

</mosaic_0001>

<bundles_post_ra>
// kernel: robust_layer.1
= control target key start
LH: loop header
LB: loop body
LE: loop exit
PB: predicated region body
PF: predicated region fallthrough
CT: control target
= control target key end

     0   :  { %s3339_s0 = inlined_call_operand.hbm [shape: f32[256,256], index: 0, kind: input, shape index: {}]   ;;  %s3340_s1 = inlined_call_operand.hbm [shape: f32[256,256], index: 1, kind: input, shape index: {}]   ;;  %s3341_s2 = inlined_call_operand.hbm [shape: bf16[256,256], index: 2, kind: input, shape index: {}]   ;;  %s3342_s3 = inlined_call_operand.hbm [shape: bf16[256,256], index: 3, kind: input, shape index: {}]   ;;  %s3343_s4 = inlined_call_operand.hbm [shape: bf16[256,256], index: 4, kind: input, shape index: {}]   ;;  %s3344_s5 = inlined_call_operand.vmem [shape: f32[1,256], index: 5, kind: input, shape index: {}]   ;;  %s3345_s6 = inlined_call_operand.vmem [shape: f32[1,256], index: 6, kind: input, shape index: {}]   ;;  %s3346_s7 = inlined_call_operand.hbm [shape: f32[256,256], index: 7, kind: output, shape index: {}]  }
   0x1   :  { %3351 = sst [smem:[#allocation18_spill]] %s3339_s0 }
   0x2   :  { %3352 = sst [smem:[#allocation19_spill]] %s3341_s2 }
   0x3   :  { %3353 = sst [smem:[#allocation20_spill]] %s3342_s3 }
   0x4   :  { %12 = vsyncpa [#allocation3], 0 }
   0x5   :  { %14 = vsyncpa [#allocation3 + $0x1], 0 }
   0x6   :  { %15 = vsyncpa [#allocation6], 0 }
   0x7   :  { %17 = vsyncpa [#allocation6 + $0x1], 0 }
   0x8   :  { %18 = vsyncpa [#allocation9], 0 }
   0x9   :  { %19 = vsyncpa [#allocation4], 0 }
   0xa   :  { %21 = vsyncpa [#allocation4 + $0x1], 0  ;;  %s2724_s24 = smov 0   ;;  %s2726_s25 = smov 0  }
   0xb   :  { %s2728_s26 = smov 0   ;;  %s2730_s27 = smov 0  }
   0xc LB: > { %s2745_s28 = sadd.s32 4294967295, %s2670_s27   ;;  %s1863_s29 = sadd.s32 4294967294, %s2670_s27   ;;  %s2670_s27 = sphi %s2730_s27, %s3378_s27   ;;  %s2666_s26 = sphi %s2728_s26, %s3377_s26   ;;  %s2662_s25 = sphi %s2726_s25, %s3376_s25   ;;  %s2658_s24 = sphi %s2724_s24, %s3375_s24  }
   0xd   : > { %p47_p0 = scmp.ne.s32.totalorder %s2662_s25, %s2658_s24  ;;  %p3347_p1 = scmp.eq.s32.totalorder %s2745_s28, 0 }
   0xe   : > { %p208_p3 = scmp.eq.s32.totalorder %s1863_s29, 1  ;;  %p1864_p5 = scmp.ge.s32.totalorder %s2670_s27, 1 }
   0xf   : > { %p2754_p4 = por %p3347_p1, %p47_p0  ;;  %p215_p7 = scmp.lt.s32.totalorder %s2670_s27, 3 }
  0x10   : > { %p2759_p6 = por %p208_p3, %p47_p0  ;;  %s2672_s10 = smov [#allocation7]  }
  0x11   : > { %s3354_s30 = scalar_select %p2754_p4, 1, 0 }
  0x12   : > { %s3355_s8 = scalar_select %p2759_p6, 1, 0 }
  0x13   : > { %p2764_p8 = pnand %p1864_p5, %p215_p7  ;;  %s227_s11 = sshll.u32 %s2672_s10, 4  ;;  %s2768_s11 = int_to_ptr.vmem [resolvable:$true] %s227_s11 }
  0x14   : > { %3356 = sst [smem:[#allocation17_spill]] %s3355_s8  ;;  %s2673_s13 = smov [#allocation8]  }
  0x15   : > { %s3357_s9 = scalar_select %p2764_p8, 1, 0 }
  0x16   : > { %p2106_p9 = pneg %p2764_p8  ;;  %s240_s14 = sshll.u32 %s2673_s13, 4  ;;  %s2779_s14 = int_to_ptr.vmem [resolvable:$true] %s240_s14 }
  0x17   : > { %s2674_s15 = smov [#allocation10]   ;;  %s3359_s2 = sld [smem:[#allocation19_spill]] }
  0x18   : > { %p2775_p11 = pnand %p2106_p9, %p3347_p1  ;;  %s2781_s16 = sshll.u32 %s2674_s15, 4  ;;  %s254_s16 = int_to_ptr.vmem [resolvable:$true] %s2781_s16 }
  0x1a   : > { %p2791_p13 = pneg %p2775_p11 }
  0x1d   : > { %s2448_s19 = scalar_lea.hbm %s3359_s2, 4096 }
  0x1e   : > { %p2449_p12 = scmp.ne.s32.totalorder %s3359_s2, %s2448_s19  ;;  %p2455_p5 = scmp.lt.u32.totalorder %s2448_s19, %s3359_s2 }
  0x20   : > { %p2451_p0 = pnand %p2791_p13, %p2449_p12 }
  0x22   : > { %p2452_p3 = pneg %p2451_p0 }
  0x24   : > { %p2457_p7 = pnand %p2455_p5, %p2452_p3 }
  0x26   : > { %2460 = shalt.err (!%p2457_p7)
}
  0x27   : > { %s2461_s10 = scalar_lea.vmem %s2768_s11, 4096  ;;  %p2469_p2 = scmp.lt.s32.totalorder %s2768_s11, %s2768_s11 }
  0x28   : > { %p2462_p9 = scmp.ne.s32.totalorder %s2768_s11, %s2461_s10  ;;  %p2470_p6 = scmp.lt.s32.totalorder %s2461_s10, %s2461_s10 }
  0x2a   : > { %p2464_p10 = pnand %p2462_p9, %p2791_p13  ;;  %p2471_p12 = por %p2470_p6, %p2469_p2 }
  0x2c   : > { %p2465_p1 = pneg %p2464_p10 }
  0x2e   : > { %p2472_p0 = pnand %p2471_p12, %p2465_p1 }
  0x30   : > { %2475 = shalt.err (!%p2472_p0)
}
  0x31   : > { %s2675_s13 = smov 128   ;;  %s2676_s15 = smov 8  }
  0x32   : > { %2109 = dma.hbm_to_vmem [thread:$0]  (!%p2775_p11), %s3359_s2, 4096, %s2768_s11, [#allocation6], %s2675_s13, %s2675_s13, %s2676_s15  }
  0x33   : > { %s3361_s3 = sld [smem:[#allocation20_spill]] }
  0x39   : > { %s2476_s21 = scalar_lea.hbm %s3361_s3, 4096 }
  0x3a   : > { %p2477_p1 = scmp.ne.s32.totalorder %s3361_s3, %s2476_s21  ;;  %p2483_p10 = scmp.lt.u32.totalorder %s2476_s21, %s3361_s3 }
  0x3c   : > { %p2479_p2 = pnand %p2477_p1, %p2791_p13 }
  0x3e   : > { %p2480_p6 = pneg %p2479_p2 }
  0x40   : > { %p2485_p3 = pnand %p2483_p10, %p2480_p6 }
  0x42   : > { %2488 = shalt.err (!%p2485_p3)
}
  0x43   : > { %s2489_s11 = scalar_lea.vmem %s2779_s14, 4096  ;;  %p2497_p12 = scmp.lt.s32.totalorder %s2779_s14, %s2779_s14 }
  0x44   : > { %p2490_p5 = scmp.ne.s32.totalorder %s2779_s14, %s2489_s11  ;;  %p2498_p0 = scmp.lt.s32.totalorder %s2489_s11, %s2489_s11 }
  0x46   : > { %p2492_p7 = pnand %p2490_p5, %p2791_p13  ;;  %p2499_p1 = por %p2498_p0, %p2497_p12 }
  0x48   : > { %p2493_p9 = pneg %p2492_p7 }
  0x4a   : > { %p2500_p2 = pnand %p2499_p1, %p2493_p9 }
  0x4c   : > { %2503 = shalt.err (!%p2500_p2)
}
  0x4d   : > { %2112 = dma.hbm_to_vmem [thread:$0]  (!%p2775_p11), %s3361_s3, 4096, %s2779_s14, [#allocation9], %s2675_s13, %s2675_s13, %s2676_s15  }
  0x4e   : > { %s2504_s20 = scalar_lea.hbm %s3343_s4, 4096 }
  0x4f   : > { %p2505_p6 = scmp.ne.s32.totalorder %s3343_s4, %s2504_s20  ;;  %p2511_p5 = scmp.lt.u32.totalorder %s2504_s20, %s3343_s4 }
  0x51   : > { %p2507_p10 = pnand %p2505_p6, %p2791_p13 }
  0x53   : > { %p2508_p3 = pneg %p2507_p10 }
  0x55   : > { %p2513_p7 = pnand %p2511_p5, %p2508_p3 }
  0x57   : > { %2516 = shalt.err (!%p2513_p7)
}
  0x58   : > { %s2517_s11 = scalar_lea.vmem %s254_s16, 4096  ;;  %p2525_p1 = scmp.lt.s32.totalorder %s254_s16, %s254_s16 }
  0x59   : > { %p2518_p9 = scmp.ne.s32.totalorder %s254_s16, %s2517_s11  ;;  %p2526_p2 = scmp.lt.s32.totalorder %s2517_s11, %s2517_s11 }
  0x5b   : > { %p2520_p12 = pnand %p2518_p9, %p2791_p13  ;;  %p2527_p4 = por %p2526_p2, %p2525_p1 }
  0x5d   : > { %p2521_p0 = pneg %p2520_p12 }
  0x5f   : > { %p2528_p8 = pnand %p2527_p4, %p2521_p0 }
  0x61   : > { %2531 = shalt.err (!%p2528_p8)
}
  0x62   : > { %2115 = dma.hbm_to_vmem [thread:$0]  (!%p2775_p11), %s3343_s4, 4096, %s254_s16, [#allocation9], %s2675_s13, %s2675_s13, %s2676_s15  }
  0x63   : > { %s2864_s12 = sadd.s32 1, %s2670_s27   ;;  %s34_s17 = sadd.s32 1, %s2666_s26 }
  0x64   : > { %s31_s22 = ssub.s32 %s2670_s27, %s2864_s12  ;;  %p41_p8 = scmp.ne.s32.totalorder %s2666_s26, %s2662_s25 }
  0x65   : > { %p32_p4 = scmp.eq.s32.totalorder %s31_s22, 0  ;;  %p42_p13 = scmp.eq.s32.totalorder %s2670_s27, 0 }
  0x66   : > { %p2130_p6 = scmp.lt.s32.totalorder %s2670_s27, 2  ;;  %p3362_p3 = scmp.eq.s32.totalorder %s2745_s28, 1 }
  0x67   : > { %s2874_s18 = scalar_select %p32_p4, %s2666_s26, %s34_s17  }
  0x68   : > { %p43_p10 = por %p42_p13, %p41_p8  ;;  %p2878_p5 = por %p3362_p3, %p41_p8 }
  0x69   : > { %s273_s20 = sand.u32 1, %s2666_s26   ;;  %s2019_s21 = sshll.u32 %s2670_s27, 12 }
  0x6a   : > { %s2884_s16 = sshll.u32 %s273_s20, 8  ;;  %s3364_s0 = sld [smem:[#allocation18_spill]] }
  0x6b   : > { %s277_s29 = scalar_lea.vmem [#allocation2], %s2884_s16  ;;  %p2894_p11 = pnand %p2130_p6, %p43_p10 }
  0x6c   : > { %s285_s10 = sshll.u32 %s277_s29, 4  ;;  %s2900_s14 = scalar_lea.sflag [#allocation3], %s273_s20  ;;  %s2898_s10 = int_to_ptr.vmem [resolvable:$true] %s285_s10 }
  0x6d   : > { %p2534_p9 = pneg %p2894_p11 }
  0x70   : > { %s2891_s23 = scalar_lea.hbm %s3364_s0, %s2019_s21  ;;  %s2537_s13 = scalar_lea.hbm %s3364_s0, 8192 }
  0x71   : > { %s2532_s8 = scalar_lea.hbm %s2891_s23, 4096  ;;  %p2538_p1 = scmp.lt.u32.totalorder %s2891_s23, %s3364_s0 }
  0x72   : > { %p2533_p7 = scmp.ne.s32.totalorder %s2891_s23, %s2532_s8  ;;  %p2539_p2 = scmp.lt.u32.totalorder %s2537_s13, %s2532_s8 }
  0x73   : > { %p2541_p8 = scmp.lt.u32.totalorder %s2532_s8, %s2891_s23 }
  0x74   : > { %p2535_p12 = pnand %p2534_p9, %p2533_p7  ;;  %p2540_p4 = por %p2539_p2, %p2538_p1 }
  0x76   : > { %p2536_p0 = pneg %p2535_p12  ;;  %p2542_p13 = por %p2541_p8, %p2540_p4 }
  0x78   : > { %p2543_p6 = pnand %p2542_p13, %p2536_p0 }
  0x7a   : > { %2546 = shalt.err (!%p2543_p6)
}
  0x7b   : > { %s2547_s20 = scalar_lea.vmem %s2898_s10, 4096  ;;  %s2677_s22 = smov [#allocation2]  }
  0x7c   : > { %p2548_p10 = scmp.ne.s32.totalorder %s2898_s10, %s2547_s20  ;;  %s2552_s17 = sshll.u32 %s2677_s22, 4  ;;  %s2553_s17 = int_to_ptr.vmem [resolvable:$false] %s2552_s17 }
  0x7d   : > { %s2554_s15 = scalar_lea.vmem %s2553_s17, 8192  ;;  %p2555_p12 = scmp.lt.s32.totalorder %s2898_s10, %s2553_s17 }
  0x7e   : > { %p2550_p3 = pnand %p2548_p10, %p2534_p9  ;;  %p2556_p1 = scmp.lt.s32.totalorder %s2554_s15, %s2547_s20 }
  0x80   : > { %p2551_p7 = pneg %p2550_p3  ;;  %p2557_p2 = por %p2556_p1, %p2555_p12 }
  0x82   : > { %p2558_p4 = pnand %p2557_p2, %p2551_p7 }
  0x84   : > { %2561 = shalt.err (!%p2558_p4)
}
  0x85   : > { %s2678_s8 = smov 256   ;;  %s2679_s13 = smov 16  }
  0x86   : > { %2119 = dma.hbm_to_vmem [thread:$0]  (!%p2894_p11), %s2891_s23, 4096, %s2898_s10, %s2900_s14, %s2678_s8, %s2678_s8, %s2679_s13  }
  0x87   : > { %s2936_s22 = scalar_lea.hbm %s3340_s1, %s2019_s21  ;;  %s299_s17 = scalar_lea.vmem [#allocation5], %s2884_s16 }
  0x88   : > { %s307_s15 = sshll.u32 %s299_s17, 4  ;;  %s295_s0 = sand.u32 1, %s2670_s27   ;;  %s2940_s15 = int_to_ptr.vmem [resolvable:$true] %s307_s15 }
  0x89   : > { %s2942_s2 = scalar_lea.sflag [#allocation6], %s295_s0  ;;  %s2562_s3 = scalar_lea.hbm %s2936_s22, 4096 }
  0x8a   : > { %p2563_p0 = scmp.ne.s32.totalorder %s2936_s22, %s2562_s3  ;;  %s2567_s10 = scalar_lea.hbm %s3340_s1, 8192 }
  0x8b   : > { %p2568_p6 = scmp.lt.u32.totalorder %s2936_s22, %s3340_s1  ;;  %p2569_p10 = scmp.lt.u32.totalorder %s2567_s10, %s2562_s3 }
  0x8c   : > { %p2565_p8 = pnand %p2563_p0, %p2534_p9  ;;  %p2571_p7 = scmp.lt.u32.totalorder %s2562_s3, %s2936_s22 }
  0x8d   : > { %p2570_p3 = por %p2569_p10, %p2568_p6 }
  0x8e   : > { %p2566_p13 = pneg %p2565_p8 }
  0x8f   : > { %p2572_p12 = por %p2571_p7, %p2570_p3 }
  0x91   : > { %p2573_p1 = pnand %p2572_p12, %p2566_p13 }
  0x93   : > { %2576 = shalt.err (!%p2573_p1)
}
  0x94   : > { %s2577_s0 = scalar_lea.vmem %s2940_s15, 4096  ;;  %s2680_s16 = smov [#allocation5]  }
  0x95   : > { %p2578_p2 = scmp.ne.s32.totalorder %s2940_s15, %s2577_s0  ;;  %s2582_s20 = sshll.u32 %s2680_s16, 4  ;;  %s2583_s20 = int_to_ptr.vmem [resolvable:$false] %s2582_s20 }
  0x96   : > { %s2584_s17 = scalar_lea.vmem %s2583_s20, 8192  ;;  %p2585_p8 = scmp.lt.s32.totalorder %s2940_s15, %s2583_s20 }
  0x97   : > { %p2580_p4 = pnand %p2578_p2, %p2534_p9  ;;  %p2586_p6 = scmp.lt.s32.totalorder %s2584_s17, %s2577_s0 }
  0x99   : > { %p2581_p0 = pneg %p2580_p4  ;;  %p2587_p10 = por %p2586_p6, %p2585_p8 }
  0x9b   : > { %p2588_p3 = pnand %p2587_p10, %p2581_p0 }
  0x9d   : > { %2591 = shalt.err (!%p2588_p3)
}
  0x9e   : > { %2122 = dma.hbm_to_vmem [thread:$0]  (!%p2894_p11), %s2936_s22, 4096, %s2940_s15, %s2942_s2, %s2678_s8, %s2678_s8, %s2679_s13  }
  0x9f   : > { %p3366_p9 = scmp.ne.s32.totalorder %s3357_s9, 0 }
  0xa0   : > { %s2974_s3 = sand.u32 (!%p3366_p9), 1, %s2662_s25   ;;  %p3367_p13 = scmp.ne.s32.totalorder (!%p3366_p9), %s3354_s30, 0 }
  0xa1   : > { %319 = sbr.rel (%p3366_p9) target bundleno = 783 (0x30f), region = 48  ;;  %s2977_s23 = sshll.u32 (!%p3366_p9), %s2974_s3, 8 }
  0xa2   : > { %s322_s11 = scalar_lea.sflag (!%p3366_p9), [#allocation3], %s2974_s3  ;;  %s2981_s21 = scalar_lea.vmem (!%p3366_p9), [#allocation2], %s2977_s23 }
  0xa8   : > { %2637 = dma.done.wait (%p3367_p13), %s322_s11, 4096  }
  0xa9   : > { %2639 = vsyncadd (%p3367_p13), %s322_s11, 4294963200  ;;  %s330_s2 = sand.u32 1, %s2745_s28   ;;  %s2989_s8 = scalar_lea.vmem [#allocation5], %s2977_s23 }
  0xaa   : > { %s331_s9 = scalar_lea.sflag [#allocation6], %s330_s2 }
  0xab   : > { %2641 = dma.done.wait (%p3367_p13), %s331_s9, 4096  }
  0xac   : > { %2643 = vsyncadd (%p3367_p13), %s331_s9, 4294963200  ;;  %p3368_p11 = scmp.eq.s32.totalorder %s2745_s28, 0 }
  0xae   : > { %2645 = dma.done.wait (%p3368_p11), [#allocation6], 4096   ;;  %p3369_p7 = pmov %p3368_p11 }
  0xb0   : > { %2647 = vsyncadd (%p3369_p7), [#allocation6], 4294963200  ;;  %p3370_p12 = pmov %p3369_p7 }
  0xb1   : > { %p3371_p1 = pmov %p3369_p7 }
  0xb2   : > { %2649 = dma.done.wait (%p3370_p12), [#allocation9], 8192  }
  0xb3   : > { %2651 = vsyncadd (%p3371_p1), [#allocation9], 4294959104  ;;  %v2176_v0 = vld [vmem:[#allocation7 + $0x4] ss:$8 sps:$4 sm:$0xff]   ;;  %v2178_v1 = vld [vmem:[#allocation7] ss:$8 sps:$4 sm:$0xff]  }
  0xb4   : > { %637 = vmatprep.subr.bf16.mxu0 %v2176_v0  ;;  %v2179_v2 = vld [vmem:[#allocation7 + $0x14] ss:$8 sps:$4 sm:$0xff]   ;;  %v2181_v3 = vld [vmem:[#allocation7 + $0x10] ss:$8 sps:$4 sm:$0xff]   ;;  %v2182_v4 = vld [vmem:[#allocation7 + $0x24] ss:$8 sps:$4 sm:$0xff]  }
  0xb5   : > { %638 = vmatpush1.bf16.msra.mxu0 %v2178_v1  ;;  %v2184_v5 = vld [vmem:[#allocation7 + $0x20] ss:$8 sps:$4 sm:$0xff]   ;;  %v2185_v6 = vld [vmem:[#allocation7 + $0x34] ss:$8 sps:$4 sm:$0xff]   ;;  %v2187_v7 = vld [vmem:[#allocation7 + $0x30] ss:$8 sps:$4 sm:$0xff]  }
  0xb6   : > { %639 = vmatprep.subr.bf16.mxu0 %v2179_v2  ;;  %v2188_v8 = vld [vmem:[#allocation7 + $0x44] ss:$8 sps:$4 sm:$0xff]   ;;  %v2190_v9 = vld [vmem:[#allocation7 + $0x40] ss:$8 sps:$4 sm:$0xff]   ;;  %v2191_v10 = vld [vmem:[#allocation7 + $0x54] ss:$8 sps:$4 sm:$0xff]  }
  0xb7   : > { %v2193_v11 = vld [vmem:[#allocation7 + $0x50] ss:$8 sps:$4 sm:$0xff]   ;;  %v2194_v12 = vld [vmem:[#allocation7 + $0x64] ss:$8 sps:$4 sm:$0xff]   ;;  %v2196_v16 = vld [vmem:[#allocation7 + $0x60] ss:$8 sps:$4 sm:$0xff]  }
  0xb8   : > { %v386_v13 = vld [vmem:[%s2981_s21 + $0x8] sm:$0xff]  ;;  %v388_v14 = vld [vmem:[%s2981_s21 + $0x18] sm:$0xff]  ;;  %v385_v50 = vld [vmem:[%s2981_s21] sm:$0xff]  ;;  %s3222_s10 = scalar_lea.vmem [#allocation11], %s2977_s23  ;;  %s2023_s14 = sshll.u32 %s2745_s28, 12 }
  0xb9   : > { %640 = vmatpush1.bf16.msra.mxu0 %v2181_v3  ;;  %v418_v15 = vpack.c.bf16 %v388_v14, %v386_v13  ;;  %v2197_v17 = vld [vmem:[#allocation7 + $0x74] ss:$8 sps:$4 sm:$0xff]   ;;  %v2199_v18 = vld [vmem:[#allocation7 + $0x70] ss:$8 sps:$4 sm:$0xff]   ;;  %v2200_v19 = vld [vmem:[#allocation7 + $0x84] ss:$8 sps:$4 sm:$0xff]   ;;  %s3290_s20 = scalar_lea.hbm %s3346_s7, %s2023_s14 }
  0xba   : > { %641 = vmatprep.subr.bf16.mxu0 %v2182_v4  ;;  %v2202_v20 = vld [vmem:[#allocation7 + $0x80] ss:$8 sps:$4 sm:$0xff]   ;;  %v2203_v21 = vld [vmem:[#allocation7 + $0x94] ss:$8 sps:$4 sm:$0xff]   ;;  %v2224_v22 = vld [vmem:[#allocation10 + $0x4] ss:$8 sps:$4 sm:$0xff]  }
  0xbb   : > { %669 = vmatprep.mubr.bf16.mxu0 %v418_v15  ;;  %v2226_v23 = vld [vmem:[#allocation10] ss:$8 sps:$4 sm:$0xff]   ;;  %v2205_v24 = vld [vmem:[#allocation7 + $0x90] ss:$8 sps:$4 sm:$0xff]   ;;  %1230 = vmatprep.subr.bf16.mxu1 %v2224_v22  ;;  %v2227_v25 = vld [vmem:[#allocation10 + $0x14] ss:$8 sps:$4 sm:$0xff]  }
  0xbc   : > { %v2206_v26 = vld [vmem:[#allocation7 + $0xa4] ss:$8 sps:$4 sm:$0xff]   ;;  %1231 = vmatpush1.bf16.msra.mxu1 %v2226_v23  ;;  %v2229_v27 = vld [vmem:[#allocation10 + $0x10] ss:$8 sps:$4 sm:$0xff]   ;;  %v2208_v29 = vld [vmem:[#allocation7 + $0xa0] ss:$8 sps:$4 sm:$0xff]  }
  0xbd   : > { %642 = vmatpush1.bf16.msra.mxu0 %v2184_v5  ;;  %1232 = vmatprep.subr.bf16.mxu1 %v2227_v25  ;;  %v2230_v28 = vld [vmem:[#allocation10 + $0x24] ss:$8 sps:$4 sm:$0xff]   ;;  %v2209_v30 = vld [vmem:[#allocation7 + $0xb4] ss:$8 sps:$4 sm:$0xff]   ;;  %v2232_v31 = vld [vmem:[#allocation10 + $0x20] ss:$8 sps:$4 sm:$0xff]  }
  0xbe   : > { %643 = vmatprep.subr.bf16.mxu0 %v2185_v6  ;;  %v2233_v32 = vld [vmem:[#allocation10 + $0x34] ss:$8 sps:$4 sm:$0xff]   ;;  %v2211_v33 = vld [vmem:[#allocation7 + $0xb0] ss:$8 sps:$4 sm:$0xff]   ;;  %v2212_v34 = vld [vmem:[#allocation7 + $0xc4] ss:$8 sps:$4 sm:$0xff]  }
  0xbf   : > { %v2235_v35 = vld [vmem:[#allocation10 + $0x30] ss:$8 sps:$4 sm:$0xff]   ;;  %v2236_v36 = vld [vmem:[#allocation10 + $0x44] ss:$8 sps:$4 sm:$0xff]   ;;  %v2214_v37 = vld [vmem:[#allocation7 + $0xc0] ss:$8 sps:$4 sm:$0xff]  }
  0xc0   : > { %1233 = vmatpush1.bf16.msra.mxu1 %v2229_v27  ;;  %v2215_v38 = vld [vmem:[#allocation7 + $0xd4] ss:$8 sps:$4 sm:$0xff]   ;;  %v2238_v39 = vld [vmem:[#allocation10 + $0x40] ss:$8 sps:$4 sm:$0xff]   ;;  %v2217_v41 = vld [vmem:[#allocation7 + $0xd0] ss:$8 sps:$4 sm:$0xff]  }
  0xc1   : > { %644 = vmatpush1.bf16.msra.mxu0 %v2187_v7  ;;  %1234 = vmatprep.subr.bf16.mxu1 %v2230_v28  ;;  %v2239_v40 = vld [vmem:[#allocation10 + $0x54] ss:$8 sps:$4 sm:$0xff]   ;;  %v2218_v42 = vld [vmem:[#allocation7 + $0xe4] ss:$8 sps:$4 sm:$0xff]   ;;  %v2241_v43 = vld [vmem:[#allocation10 + $0x50] ss:$8 sps:$4 sm:$0xff]  }
  0xc2   : > { %645 = vmatprep.subr.bf16.mxu0 %v2188_v8  ;;  %v2242_v44 = vld [vmem:[#allocation10 + $0x64] ss:$8 sps:$4 sm:$0xff]   ;;  %v2220_v45 = vld [vmem:[#allocation7 + $0xe0] ss:$8 sps:$4 sm:$0xff]   ;;  %v2221_v46 = vld [vmem:[#allocation7 + $0xf4] ss:$8 sps:$4 sm:$0xff]  }
  0xc3   : > { %v2244_v47 = vld [vmem:[#allocation10 + $0x60] ss:$8 sps:$4 sm:$0xff]   ;;  %v2245_v48 = vld [vmem:[#allocation10 + $0x74] ss:$8 sps:$4 sm:$0xff]   ;;  %v2223_v49 = vld [vmem:[#allocation7 + $0xf0] ss:$8 sps:$4 sm:$0xff]  }
  0xc4   : > { %1235 = vmatpush1.bf16.msra.mxu1 %v2232_v31  ;;  %v387_v51 = vld [vmem:[%s2981_s21 + $0x10] sm:$0xff]  ;;  %v390_v52 = vld [vmem:[%s2981_s21 + $0x28] sm:$0xff]  ;;  %v392_v53 = vld [vmem:[%s2981_s21 + $0x38] sm:$0xff]  ;;  %s1739_s29 = sshll.u32 %s3222_s10, 4  ;;  %s1725_s28 = scalar_lea.sflag [#allocation4], %s2974_s3  ;;  %s3292_s29 = int_to_ptr.vmem [resolvable:$true] %s1739_s29 }
  0xc5   : > { %646 = vmatpush1.bf16.msra.mxu0 %v2190_v9  ;;  %1236 = vmatprep.subr.bf16.mxu1 %v2233_v32  ;;  %v2247_v54 = vld [vmem:[#allocation10 + $0x70] ss:$8 sps:$4 sm:$0xff]   ;;  %v2248_v55 = vld [vmem:[#allocation10 + $0x84] ss:$8 sps:$4 sm:$0xff]   ;;  %v417_v57 = vpack.c.bf16 %v387_v51, %v385_v50  ;;  %v2250_v58 = vld [vmem:[#allocation10 + $0x80] ss:$8 sps:$4 sm:$0xff]   ;;  %v420_v60 = vpack.c.bf16 %v392_v53, %v390_v52 }
  0xc6   : > { %647 = vmatprep.subr.bf16.mxu0 %v2191_v10  ;;  %v3009_v56 = vld [vmem:[#allocation8 + $0x4] ss:$8 sps:$4 sm:$0xff]   ;;  %v993_v61 = vld [vmem:[%s2989_s8 + $0x18] sm:$0xff]  ;;  %v3013_v62 = vld [vmem:[#allocation8] ss:$8 sps:$4 sm:$0xff]   ;;  %s2592_s17 = scalar_lea.vmem %s3292_s29, 4096 }
  0xc7   : > { %v991_v59 = vld [vmem:[%s2989_s8 + $0x8] sm:$0xff]  ;;  %v2254_v63 = vld [vmem:[#allocation10 + $0x94] ss:$8 sps:$4 sm:$0xff]   ;;  %v389_v2 = vld [vmem:[%s2981_s21 + $0x20] sm:$0xff]  ;;  %p2593_p2 = scmp.ne.s32.totalorder %s3292_s29, %s2592_s17  ;;  %s2681_s23 = smov [#allocation11]  }
  0xc8   : > { %1237 = vmatpush1.bf16.msra.mxu1 %v2235_v35  ;;  %v3016_v0 = vld [vmem:[#allocation8 + $0x14] ss:$8 sps:$4 sm:$0xff]   ;;  %v1023_v1 = vpack.c.bf16 %v993_v61, %v991_v59  ;;  %v2256_v4 = vld [vmem:[#allocation10 + $0x90] ss:$8 sps:$4 sm:$0xff]   ;;  %v394_v5 = vld [vmem:[%s2981_s21 + $0x48] sm:$0xff]  ;;  %s2596_s11 = sshll.u32 %s2681_s23, 4  ;;  %s2597_s11 = int_to_ptr.vmem [resolvable:$false] %s2596_s11 }
  0xc9   : > { %648 = vmatpush1.bf16.msra.mxu0 %v2193_v11  ;;  %1238 = vmatprep.subr.bf16.mxu1 %v2236_v36  ;;  %v391_v3 = vld [vmem:[%s2981_s21 + $0x30] sm:$0xff]  ;;  %v396_v6 = vld [vmem:[%s2981_s21 + $0x58] sm:$0xff]  ;;  %v2260_v8 = vld [vmem:[#allocation10 + $0xa4] ss:$8 sps:$4 sm:$0xff]   ;;  %p2594_p4 = pnand %p2593_p2, %p2878_p5  ;;  %p2599_p8 = scmp.lt.s32.totalorder %s3292_s29, %s2597_s11 }
  0xca   : > { %649 = vmatprep.subr.bf16.mxu0 %v2194_v12  ;;  %v3022_v7 = vld [vmem:[#allocation8 + $0x10] ss:$8 sps:$4 sm:$0xff]   ;;  %1262 = vmatprep.mubr.bf16.mxu1 %v1023_v1  ;;  %v3024_v9 = vld [vmem:[#allocation8 + $0x24] ss:$8 sps:$4 sm:$0xff]   ;;  %v419_v10 = vpack.c.bf16 %v391_v3, %v389_v2  ;;  %v422_v11 = vpack.c.bf16 %v396_v6, %v394_v5  ;;  %v2262_v12 = vld [vmem:[#allocation10 + $0xa0] ss:$8 sps:$4 sm:$0xff]  }
  0xcb   : > { %v3029_v13 = vld [vmem:[#allocation8 + $0x20] ss:$8 sps:$4 sm:$0xff]   ;;  %v2266_v14 = vld [vmem:[#allocation10 + $0xb4] ss:$8 sps:$4 sm:$0xff]   ;;  %v2272_v22 = vld [vmem:[#allocation10 + $0xc4] ss:$8 sps:$4 sm:$0xff]   ;;  %p2595_p0 = pneg %p2594_p4 }
  0xcc   : > { %1239 = vmatpush1.bf16.msra.mxu1 %v2238_v39  ;;  %v3032_v15 = vld [vmem:[#allocation8 + $0x34] ss:$8 sps:$4 sm:$0xff]   ;;  %v3042_v23 = vld [vmem:[#allocation8 + $0x44] ss:$8 sps:$4 sm:$0xff]   ;;  %v3045_v27 = vld [vmem:[#allocation8 + $0x40] ss:$8 sps:$4 sm:$0xff]  }
  0xcd   : > { %650 = vmatpush1.bf16.msra.mxu0 %v2196_v16  ;;  %1240 = vmatprep.subr.bf16.mxu1 %v2239_v40  ;;  %v393_v16 = vld [vmem:[%s2981_s21 + $0x40] sm:$0xff]  ;;  %v2278_v28 = vld [vmem:[#allocation10 + $0xd4] ss:$8 sps:$4 sm:$0xff]   ;;  %v402_v32 = vld [vmem:[%s2981_s21 + $0x88] sm:$0xff] }
  0xce   : > { %651 = vmatprep.subr.bf16.mxu0 %v2197_v17  ;;  %v395_v17 = vld [vmem:[%s2981_s21 + $0x50] sm:$0xff]  ;;  %v2284_v36 = vld [vmem:[#allocation10 + $0xe4] ss:$8 sps:$4 sm:$0xff]   ;;  %v2286_v40 = vld [vmem:[#allocation10 + $0xe0] ss:$8 sps:$4 sm:$0xff]  }
  0xcf   : > { %v399_v31 = vld [vmem:[%s2981_s21 + $0x70] sm:$0xff]  ;;  %v405_v52 = vld [vmem:[%s2981_s21 + $0xa0] sm:$0xff]  ;;  %v414_v61 = vld [vmem:[%s2981_s21 + $0xe8] sm:$0xff] }
  0xd0   : > { %1241 = vmatpush1.bf16.msra.mxu1 %v2241_v43  ;;  %v3055_v35 = vld [vmem:[#allocation8 + $0x50] ss:$8 sps:$4 sm:$0xff]   ;;  %v3064_v43 = vld [vmem:[#allocation8 + $0x74] ss:$8 sps:$4 sm:$0xff]   ;;  %v409_v59 = vld [vmem:[%s2981_s21 + $0xc0] sm:$0xff] }
  0xd1   : > { %652 = vmatpush1.bf16.msra.mxu0 %v2199_v18  ;;  %1242 = vmatprep.subr.bf16.mxu1 %v2242_v44  ;;  %v398_v18 = vld [vmem:[%s2981_s21 + $0x68] sm:$0xff]  ;;  %v401_v44 = vld [vmem:[%s2981_s21 + $0x80] sm:$0xff]  ;;  %v407_v53 = vld [vmem:[%s2981_s21 + $0xb0] sm:$0xff] }
  0xd2   : > { %653 = vmatprep.subr.bf16.mxu0 %v2200_v19  ;;  %v2268_v19 = vld [vmem:[#allocation10 + $0xb0] ss:$8 sps:$4 sm:$0xff]   ;;  %v413_v2 = vld [vmem:[%s2981_s21 + $0xe0] sm:$0xff] }
  0xd3   : > { %v415_v3 = vld [vmem:[%s2981_s21 + $0xf0] sm:$0xff]  ;;  %v990_v5 = vld [vmem:[%s2989_s8] sm:$0xff] }
  0xd4   : > { %1243 = vmatpush1.bf16.msra.mxu1 %v2244_v47  ;;  %v406_v47 = vld [vmem:[%s2981_s21 + $0xa8] sm:$0xff]  ;;  %v992_v6 = vld [vmem:[%s2989_s8 + $0x10] sm:$0xff] }
  0xd5   : > { %654 = vmatpush1.bf16.msra.mxu0 %v2202_v20  ;;  %1244 = vmatprep.subr.bf16.mxu1 %v2245_v48  ;;  %v400_v20 = vld [vmem:[%s2981_s21 + $0x78] sm:$0xff] }
  0xd6   : > { %655 = vmatprep.subr.bf16.mxu0 %v2203_v21  ;;  %v3039_v21 = vld [vmem:[#allocation8 + $0x30] ss:$8 sps:$4 sm:$0xff]   ;;  %v424_v25 = vpack.c.bf16 %v400_v20, %v398_v18  ;;  %v994_v18 = vld [vmem:[%s2989_s8 + $0x20] sm:$0xff] }
  0xd7   : > { %v408_v48 = vld [vmem:[%s2981_s21 + $0xb8] sm:$0xff] }
  0xd8   : > { %1245 = vmatpush1.bf16.msra.mxu1 %v2247_v54  ;;  %v428_v51 = vpack.c.bf16 %v408_v48, %v406_v47  ;;  %v410_v54 = vld [vmem:[%s2981_s21 + $0xc8] sm:$0xff]  ;;  %v1013_v47 = vld [vmem:[%s2989_s8 + $0xb8] sm:$0xff] }
  0xd9   : > { %656 = vmatpush1.bf16.msra.mxu0 %v2205_v24  ;;  %1246 = vmatprep.subr.bf16.mxu1 %v2248_v55  ;;  %v421_v24 = vpack.c.bf16 %v395_v17, %v393_v16  ;;  %v412_v55 = vld [vmem:[%s2981_s21 + $0xd8] sm:$0xff] }
  0xda   : > { %657 = vmatprep.subr.bf16.mxu0 %v2206_v26  ;;  %v2274_v26 = vld [vmem:[#allocation10 + $0xc0] ss:$8 sps:$4 sm:$0xff]   ;;  %v3099_v17 = vld [vmem:[#allocation8 + $0x94] ss:$8 sps:$4 sm:$0xff]  }
  0xdc   : > { %1247 = vmatpush1.bf16.msra.mxu1 %v2250_v58  ;;  %v430_v58 = vpack.c.bf16 %v412_v55, %v410_v54  ;;  %v1014_v55 = vld [vmem:[%s2989_s8 + $0xc0] sm:$0xff] }
  0xdd   : > { %658 = vmatpush1.bf16.msra.mxu0 %v2208_v29  ;;  %1248 = vmatprep.subr.bf16.mxu1 %v2254_v63  ;;  %v3048_v29 = vld [vmem:[#allocation8 + $0x54] ss:$8 sps:$4 sm:$0xff]  }
  0xde   : > { %659 = vmatprep.subr.bf16.mxu0 %v2209_v30  ;;  %v397_v30 = vld [vmem:[%s2981_s21 + $0x60] sm:$0xff]  ;;  %v416_v63 = vld [vmem:[%s2981_s21 + $0xf8] sm:$0xff] }
  0xe0   : > { %1249 = vmatpush1.bf16.msra.mxu1 %v2256_v4  ;;  %v431_v4 = vpack.c.bf16 %v415_v3, %v413_v2  ;;  %v467_v2 = vlaneseq }
  0xe1   : > { %660 = vmatpush1.bf16.msra.mxu0 %v2211_v33  ;;  %1250 = vmatprep.subr.bf16.mxu1 %v2260_v8  ;;  %v2280_v33 = vld [vmem:[#allocation10 + $0xd0] ss:$8 sps:$4 sm:$0xff]   ;;  %v1022_v8 = vpack.c.bf16 %v992_v6, %v990_v5  ;;  %v465_v5 = vld [vmem:[%s3344_s5] sm:$0x3] }
  0xe2   : > { %661 = vmatprep.subr.bf16.mxu0 %v2212_v34  ;;  %v404_v34 = vld [vmem:[%s2981_s21 + $0x98] sm:$0xff]  ;;  %v3151_v3 = vshrl.u32 %v467_v2, 7 }
  0xe3   : > { %v426_v39 = vpack.c.bf16 %v404_v34, %v402_v32  ;;  %v1005_v32 = vld [vmem:[%s2989_s8 + $0x78] sm:$0xff]  ;;  %v1002_v34 = vld [vmem:[%s2989_s8 + $0x60] sm:$0xff] }
  0xe4   : > { %1251 = vmatpush1.bf16.msra.mxu1 %v2262_v12  ;;  %v995_v12 = vld [vmem:[%s2989_s8 + $0x28] sm:$0xff]  ;;  %v473_v6 = vsub.s32 1, %v3151_v3 }
  0xe5   : > { %662 = vmatpush1.bf16.msra.mxu0 %v2214_v37  ;;  %1252 = vmatprep.subr.bf16.mxu1 %v2266_v14  ;;  %v3058_v37 = vld [vmem:[#allocation8 + $0x64] ss:$8 sps:$4 sm:$0xff]   ;;  %v997_v14 = vld [vmem:[%s2989_s8 + $0x38] sm:$0xff] }
  0xe6   : > { %663 = vmatprep.subr.bf16.mxu0 %v2215_v38  ;;  %v423_v38 = vpack.c.bf16 %v399_v31, %v397_v30  ;;  %v1025_v16 = vpack.c.bf16 %v997_v14, %v995_v12  ;;  %v1000_v30 = vld [vmem:[%s2989_s8 + $0x50] sm:$0xff]  ;;  %v2308_v31 = vld [vmem:[#allocation8 + $0xc0] ss:$8 sps:$4 sm:$0xff]  }
  0xe8   : > { %1253 = vmatpush1.bf16.msra.mxu1 %v2268_v19  ;;  %v3103_v19 = vld [vmem:[#allocation8 + $0x90] ss:$8 sps:$4 sm:$0xff]  }
  0xe9   : > { %664 = vmatpush1.bf16.msra.mxu0 %v2217_v41  ;;  %1254 = vmatprep.subr.bf16.mxu1 %v2272_v22  ;;  %v3061_v41 = vld [vmem:[#allocation8 + $0x60] ss:$8 sps:$4 sm:$0xff]  }
  0xea   : > { %665 = vmatprep.subr.bf16.mxu0 %v2218_v42  ;;  %v2290_v42 = vld [vmem:[#allocation10 + $0xf4] ss:$8 sps:$4 sm:$0xff]   ;;  %v999_v22 = vld [vmem:[%s2989_s8 + $0x48] sm:$0xff] }
  0xec   : > { %1255 = vmatpush1.bf16.msra.mxu1 %v2274_v26  ;;  %v2305_v26 = vld [vmem:[#allocation8 + $0xb0] ss:$8 sps:$4 sm:$0xff]  }
  0xed   : > { %666 = vmatpush1.bf16.msra.mxu0 %v2220_v45  ;;  %1256 = vmatprep.subr.bf16.mxu1 %v2278_v28  ;;  %v403_v45 = vld [vmem:[%s2981_s21 + $0x90] sm:$0xff]  ;;  %v998_v28 = vld [vmem:[%s2989_s8 + $0x40] sm:$0xff] }
  0xee   : > { %667 = vmatprep.subr.bf16.mxu0 %v2221_v46  ;;  %v2292_v46 = vld [vmem:[#allocation10 + $0xf0] ss:$8 sps:$4 sm:$0xff]   ;;  %v425_v50 = vpack.c.bf16 %v403_v45, %v401_v44  ;;  %v1006_v44 = vld [vmem:[%s2989_s8 + $0x80] sm:$0xff] }
  0xef   : > { %v1008_v45 = vld [vmem:[%s2989_s8 + $0x90] sm:$0xff] }
  0xf0   : > { %1257 = vmatpush1.bf16.msra.mxu1 %v2280_v33 }
  0xf1   : > { %668 = vmatpush1.bf16.msra.mxu0 %v2223_v49  ;;  %1258 = vmatprep.subr.bf16.mxu1 %v2284_v36  ;;  %v3071_v49 = vld [vmem:[#allocation8 + $0x70] ss:$8 sps:$4 sm:$0xff]  }
  0xf2   : > { %1503 = vmatprep.subr.bf16.mxu0 %v3009_v56  ;;  %v1004_v36 = vld [vmem:[%s2989_s8 + $0x70] sm:$0xff] }
  0xf4   : > { %670 = vmatmul.mubr.bf16.vlgmr.msra.gmra.mrb[0].mxu0 %v417_v57  ;;  %1259 = vmatpush1.bf16.msra.mxu1 %v2286_v40  ;;  %v427_v57 = vpack.c.bf16 %v407_v53, %v405_v52  ;;  %v1007_v40 = vld [vmem:[%s2989_s8 + $0x88] sm:$0xff]  ;;  %v1017_v53 = vld [vmem:[%s2989_s8 + $0xd8] sm:$0xff] }
  0xf5   : > { %679 = vmatprep.mubr.bf16.mxu0 %v420_v60  ;;  %1504 = vmatpush1.bf16.msra.mxu0 %v3013_v62  ;;  %v411_v60 = vld [vmem:[%s2981_s21 + $0xd0] sm:$0xff]  ;;  %v1015_v52 = vld [vmem:[%s2989_s8 + $0xc8] sm:$0xff]  ;;  %s2598_s21 = scalar_lea.vmem %s2597_s11, 8192 }
  0xf6   : > { %1505 = vmatprep.subr.bf16.mxu0 %v3016_v0  ;;  %1260 = vmatprep.subr.bf16.mxu1 %v2290_v42  ;;  %v429_v1 = vpack.c.bf16 %v411_v60, %v409_v59  ;;  %v1035_v54 = vpack.c.bf16 %v1017_v53, %v1015_v52  ;;  %v1019_v59 = vld [vmem:[%s2989_s8 + $0xe8] sm:$0xff]  ;;  %v1021_v60 = vld [vmem:[%s2989_s8 + $0xf8] sm:$0xff]  ;;  %p2600_p6 = scmp.lt.s32.totalorder %s2598_s21, %s2592_s17 }
  0xf8   : > { %1261 = vmatpush1.bf16.msra.mxu1 %v2292_v46  ;;  %v1011_v46 = vld [vmem:[%s2989_s8 + $0xa8] sm:$0xff]  ;;  %p2601_p10 = por %p2600_p6, %p2599_p8 }
  0xf9   : > { %1506 = vmatpush1.bf16.msra.mxu0 %v3022_v7  ;;  %2024 = vmatprep.subr.bf16.mxu1 %v3009_v56  ;;  %v432_v56 = vpack.c.bf16 %v416_v63, %v414_v61  ;;  %v1033_v48 = vpack.c.bf16 %v1013_v47, %v1011_v46  ;;  %v1037_v61 = vpack.c.bf16 %v1021_v60, %v1019_v59  ;;  %v1018_v63 = vld [vmem:[%s2989_s8 + $0xe0] sm:$0xff] }
  0xfa   : > { %1507 = vmatprep.subr.bf16.mxu0 %v3024_v9  ;;  %p2602_p3 = pnand %p2601_p10, %p2595_p0 }
  0xfb   : > { %1263 = vmatmul.mubr.bf16.vlgmr.msra.gmra.mrb[0].mxu1 %v1022_v8 }
  0xfc   : > { %680 = vmatmul.mubr.bf16.gmra.mrb[4].mxu0 %v419_v10  ;;  %2040 = vmatpush1.bf16.msra.mxu1 %v3013_v62  ;;  %v3089_v10 = vld [vmem:[#allocation8 + $0x84] ss:$8 sps:$4 sm:$0xff]   ;;  %v996_v62 = vld [vmem:[%s2989_s8 + $0x30] sm:$0xff] }
  0xfd   : > { %689 = vmatprep.mubr.bf16.mxu0 %v422_v11  ;;  %1508 = vmatpush1.bf16.msra.mxu0 %v3029_v13  ;;  %v3091_v11 = vld [vmem:[#allocation8 + $0x80] ss:$8 sps:$4 sm:$0xff]   ;;  %v1024_v20 = vpack.c.bf16 %v996_v62, %v994_v18 }
  0xfe   : > { %1509 = vmatprep.subr.bf16.mxu0 %v3032_v15  ;;  %2025 = vmatprep.subr.bf16.mxu1 %v3016_v0  ;;  %v2304_v0 = vld [vmem:[#allocation8 + $0xa4] ss:$8 sps:$4 sm:$0xff]  }
  0xff   : > { %1272 = vmatprep.mubr.bf16.mxu1 %v1025_v16 }
 0x100   : > { %2041 = vmatpush1.bf16.msra.mxu1 %v3022_v7  ;;  %v3109_v7 = vld [vmem:[#allocation8 + $0xa0] ss:$8 sps:$4 sm:$0xff]  }
 0x101   : > { %1510 = vmatpush1.bf16.msra.mxu0 %v3039_v21  ;;  %2026 = vmatprep.subr.bf16.mxu1 %v3024_v9  ;;  %v1001_v9 = vld [vmem:[%s2989_s8 + $0x58] sm:$0xff] }
 0x102   : > { %1511 = vmatprep.subr.bf16.mxu0 %v3042_v23 }
 0x103   : > { %1273 = vmatmul.mubr.bf16.gmra.mrb[4].mxu1 %v1024_v20 }
 0x104   : > { %690 = vmatmul.mubr.bf16.gmra.mrb[8].mxu0 %v421_v24  ;;  %2042 = vmatpush1.bf16.msra.mxu1 %v3029_v13  ;;  %v1027_v24 = vpack.c.bf16 %v1001_v9, %v999_v22  ;;  %v1026_v13 = vpack.c.bf16 %v1000_v30, %v998_v28 }
 0x105   : > { %699 = vmatprep.mubr.bf16.mxu0 %v424_v25  ;;  %1512 = vmatpush1.bf16.msra.mxu0 %v3045_v27  ;;  %v2307_v25 = vld [vmem:[#allocation8 + $0xb4] ss:$8 sps:$4 sm:$0xff]  }
 0x106   : > { %1513 = vmatprep.subr.bf16.mxu0 %v3048_v29  ;;  %2027 = vmatprep.subr.bf16.mxu1 %v3032_v15  ;;  %v2310_v15 = vld [vmem:[#allocation8 + $0xc4] ss:$8 sps:$4 sm:$0xff]  }
 0x107   : > { %1282 = vmatprep.mubr.bf16.mxu1 %v1027_v24 }
 0x108   : > { %2043 = vmatpush1.bf16.msra.mxu1 %v3039_v21  ;;  %v1003_v21 = vld [vmem:[%s2989_s8 + $0x68] sm:$0xff] }
 0x109   : > { %1514 = vmatpush1.bf16.msra.mxu0 %v3055_v35  ;;  %2028 = vmatprep.subr.bf16.mxu1 %v3042_v23  ;;  %v1029_v33 = vpack.c.bf16 %v1005_v32, %v1003_v21  ;;  %v2313_v23 = vld [vmem:[#allocation8 + $0xd4] ss:$8 sps:$4 sm:$0xff]  }
 0x10a   : > { %1515 = vmatprep.subr.bf16.mxu0 %v3058_v37 }
 0x10b   : > { %1283 = vmatmul.mubr.bf16.gmra.mrb[8].mxu1 %v1026_v13 }
 0x10c   : > { %700 = vmatmul.mubr.bf16.gmra.mrb[12].mxu0 %v423_v38  ;;  %2044 = vmatpush1.bf16.msra.mxu1 %v3045_v27  ;;  %v2311_v38 = vld [vmem:[#allocation8 + $0xd0] ss:$8 sps:$4 sm:$0xff]   ;;  %v2316_v27 = vld [vmem:[#allocation8 + $0xe4] ss:$8 sps:$4 sm:$0xff]  }
 0x10d   : > { %709 = vmatprep.mubr.bf16.mxu0 %v426_v39  ;;  %1516 = vmatpush1.bf16.msra.mxu0 %v3061_v41  ;;  %v1028_v39 = vpack.c.bf16 %v1004_v36, %v1002_v34 }
 0x10e   : > { %1517 = vmatprep.subr.bf16.mxu0 %v3064_v43  ;;  %2029 = vmatprep.subr.bf16.mxu1 %v3048_v29  ;;  %v2314_v29 = vld [vmem:[#allocation8 + $0xe0] ss:$8 sps:$4 sm:$0xff]  }
 0x10f   : > { %1292 = vmatprep.mubr.bf16.mxu1 %v1029_v33 }
 0x110   : > { %2045 = vmatpush1.bf16.msra.mxu1 %v3055_v35  ;;  %v2319_v35 = vld [vmem:[#allocation8 + $0xf4] ss:$8 sps:$4 sm:$0xff]  }
 0x111   : > { %1518 = vmatpush1.bf16.msra.mxu0 %v3071_v49  ;;  %2030 = vmatprep.subr.bf16.mxu1 %v3058_v37  ;;  %v2317_v37 = vld [vmem:[#allocation8 + $0xf0] ss:$8 sps:$4 sm:$0xff]  }
 0x112   : > { %1519 = vmatprep.subr.bf16.mxu0 %v3089_v10 }
 0x113   : > { %1293 = vmatmul.mubr.bf16.gmra.mrb[12].mxu1 %v1028_v39 }
 0x114   : > { %710 = vmatmul.mubr.bf16.gmra.mrb[16].mxu0 %v425_v50  ;;  %2046 = vmatpush1.bf16.msra.mxu1 %v3061_v41  ;;  %v1009_v41 = vld [vmem:[%s2989_s8 + $0x98] sm:$0xff]  ;;  %v1012_v50 = vld [vmem:[%s2989_s8 + $0xb0] sm:$0xff] }
 0x115   : > { %719 = vmatprep.mubr.bf16.mxu0 %v428_v51  ;;  %1520 = vmatpush1.bf16.msra.mxu0 %v3091_v11  ;;  %v1031_v42 = vpack.c.bf16 %v1009_v41, %v1007_v40 }
 0x116   : > { %1521 = vmatprep.subr.bf16.mxu0 %v3099_v17  ;;  %2031 = vmatprep.subr.bf16.mxu1 %v3064_v43  ;;  %v1030_v43 = vpack.c.bf16 %v1008_v45, %v1006_v44 }
 0x117   : > { %1302 = vmatprep.mubr.bf16.mxu1 %v1031_v42 }
 0x118   : > { %2047 = vmatpush1.bf16.msra.mxu1 %v3071_v49  ;;  %v1010_v49 = vld [vmem:[%s2989_s8 + $0xa0] sm:$0xff] }
 0x119   : > { %1522 = vmatpush1.bf16.msra.mxu0 %v3103_v19  ;;  %2032 = vmatprep.subr.bf16.mxu1 %v3089_v10  ;;  %v1032_v51 = vpack.c.bf16 %v1012_v50, %v1010_v49  ;;  %v3164_v10 = vrot.slane %v465_v5, %v473_v6 }
 0x11a   : > { %1523 = vmatprep.subr.bf16.mxu0 %v2304_v0 }
 0x11b   : > { %1303 = vmatmul.mubr.bf16.gmra.mrb[16].mxu1 %v1030_v43 }
 0x11c   : > { %720 = vmatmul.mubr.bf16.gmra.mrb[20].mxu0 %v427_v57  ;;  %2048 = vmatpush1.bf16.msra.mxu1 %v3091_v11  ;;  %v1016_v57 = vld [vmem:[%s2989_s8 + $0xd0] sm:$0xff] }
 0x11d   : > { %729 = vmatprep.mubr.bf16.mxu0 %v430_v58  ;;  %1524 = vmatpush1.bf16.msra.mxu0 %v3109_v7  ;;  %v1034_v58 = vpack.c.bf16 %v1016_v57, %v1014_v55 }
 0x11e   : > { %1525 = vmatprep.subr.bf16.mxu0 %v2307_v25  ;;  %2033 = vmatprep.subr.bf16.mxu1 %v3099_v17 }
 0x11f   : > { %1312 = vmatprep.mubr.bf16.mxu1 %v1033_v48 }
 0x120   : > { %2049 = vmatpush1.bf16.msra.mxu1 %v3103_v19 }
 0x121   : > { %1526 = vmatpush1.bf16.msra.mxu0 %v2305_v26  ;;  %2034 = vmatprep.subr.bf16.mxu1 %v2304_v0 }
 0x122   : > { %1527 = vmatprep.subr.bf16.mxu0 %v2310_v15 }
 0x123   : > { %1313 = vmatmul.mubr.bf16.gmra.mrb[20].mxu1 %v1032_v51 }
 0x124   : > { %730 = vmatmul.mubr.bf16.gmra.mrb[24].mxu0 %v429_v1  ;;  %2050 = vmatpush1.bf16.msra.mxu1 %v3109_v7  ;;  %v1020_v1 = vld [vmem:[%s2989_s8 + $0xf0] sm:$0xff] }
 0x125   : > { %739 = vmatprep.mubr.bf16.mxu0 %v432_v56  ;;  %1528 = vmatpush1.bf16.msra.mxu0 %v2308_v31  ;;  %v1036_v56 = vpack.c.bf16 %v1020_v1, %v1018_v63 }
 0x126   : > { %1529 = vmatprep.subr.bf16.mxu0 %v2313_v23  ;;  %2035 = vmatprep.subr.bf16.mxu1 %v2307_v25 }
 0x127   : > { %1322 = vmatprep.mubr.bf16.mxu1 %v1035_v54 }
 0x128   : > { %2051 = vmatpush1.bf16.msra.mxu1 %v2305_v26 }
 0x129   : > { %1530 = vmatpush1.bf16.msra.mxu0 %v2311_v38  ;;  %2036 = vmatprep.subr.bf16.mxu1 %v2310_v15 }
 0x12a   : > { %1531 = vmatprep.subr.bf16.mxu0 %v2316_v27 }
 0x12b   : > { %1323 = vmatmul.mubr.bf16.gmra.mrb[24].mxu1 %v1034_v58 }
 0x12c   : > { %740 = vmatmul.mubr.bf16.gmra.mrb[28].mxu0 %v431_v4  ;;  %2052 = vmatpush1.bf16.msra.mxu1 %v2308_v31  ;;  %v469_v4 = vsub.s32 0, %v3151_v3 }
 0x12d   : > { %1532 = vmatpush1.bf16.msra.mxu0 %v2314_v29  ;;  %2037 = vmatprep.subr.bf16.mxu1 %v2313_v23 }
 0x12e   : > { %1533 = vmatprep.subr.bf16.mxu0 %v2319_v35  ;;  %1332 = vmatprep.mubr.bf16.mxu1 %v1037_v61  ;;  %v3160_v8 = vrot.slane %v465_v5, %v469_v4 }
 0x130   : > { %2053 = vmatpush1.bf16.msra.mxu1 %v2311_v38 }
 0x131   : > { %1534 = vmatpush1.bf16.msra.mxu0 %v2317_v37  ;;  %2038 = vmatprep.subr.bf16.mxu1 %v2316_v27 }
 0x133   : > { %1333 = vmatmul.mubr.bf16.gmra.mrb[28].mxu1 %v1036_v56 }
 0x134   : > { %2054 = vmatpush1.bf16.msra.mxu1 %v2314_v29 }
 0x135   : > { %2039 = vmatprep.subr.bf16.mxu1 %v2319_v35 }
 0x138   : > { %2055 = vmatpush1.bf16.msra.mxu1 %v2317_v37 }
 0x1c7   : > { %v671_v11 = vpop.f32.mrb[0].mxu0 }
 0x1c8   : > { %v672_v12 = vadd.f32 %v671_v11, %v3160_v8  ;;  %v673_v14 = vpop.f32.mrb[1].mxu0 }
 0x1c9   : > { %v674_v16 = vadd.f32 %v673_v14, %v3164_v10  ;;  %v675_v17 = vpop.f32.mrb[2].mxu0 }
 0x1ca   : > { %v1916_v18 = vmul.f32 -1.442695, %v672_v12  ;;  %v676_v62 = vadd.f32 %v675_v17, %v3160_v8  ;;  %v677_v19 = vpop.f32.mrb[3].mxu0 }
 0x1cb   : > { %v1917_v20 = vmul.f32 -1.442695, %v674_v16  ;;  %v678_v0 = vadd.f32 %v677_v19, %v3164_v10 }
 0x1cc   : > { %2320 = vpow2.f32 %v1916_v18  ;;  %v1918_v7 = vmul.f32 -1.442695, %v676_v62 }
 0x1cd   : > { %2322 = vpow2.f32 %v1917_v20  ;;  %v1919_v22 = vmul.f32 -1.442695, %v678_v0 }
 0x1ce   : > { %2324 = vpow2.f32 %v1918_v7 }
 0x1cf   : > { %2326 = vpow2.f32 %v1919_v22  ;;  %v681_v9 = vpop.f32.mrb[4].mxu0 }
 0x1d0   : > { %v682_v24 = vadd.f32 %v681_v9, %v3160_v8  ;;  %v683_v25 = vpop.f32.mrb[5].mxu0 }
 0x1d1   : > { %v684_v26 = vadd.f32 %v683_v25, %v3164_v10  ;;  %v685_v28 = vpop.f32.mrb[6].mxu0 }
 0x1d2   : > { %v1920_v30 = vmul.f32 -1.442695, %v682_v24  ;;  %v686_v13 = vadd.f32 %v685_v28, %v3160_v8  ;;  %v687_v15 = vpop.f32.mrb[7].mxu0 }
 0x1d3   : > { %v1921_v31 = vmul.f32 -1.442695, %v684_v26  ;;  %v688_v21 = vadd.f32 %v687_v15, %v3164_v10 }
 0x1d4   : > { %2328 = vpow2.f32 %v1920_v30  ;;  %v1922_v32 = vmul.f32 -1.442695, %v686_v13 }
 0x1d5   : > { %2330 = vpow2.f32 %v1921_v31  ;;  %v1923_v33 = vmul.f32 -1.442695, %v688_v21 }
 0x1d6   : > { %v2321_v23 = vpop.eup %2320  ;;  %2332 = vpow2.f32 %v1922_v32 }
 0x1d7   : > { %v2323_v34 = vpop.eup %2322  ;;  %v846_v36 = vadd.f32 1.0, %v2321_v23  ;;  %2334 = vpow2.f32 %v1923_v33  ;;  %v691_v38 = vpop.f32.mrb[8].mxu0 }
 0x1d8   : > { %v2325_v39 = vpop.eup %2324  ;;  %v847_v27 = vadd.f32 1.0, %v2323_v34  ;;  %v692_v29 = vadd.f32 %v691_v38, %v3160_v8  ;;  %v693_v35 = vpop.f32.mrb[9].mxu0 }
 0x1d9   : > { %v2327_v37 = vpop.eup %2326  ;;  %2336 = vrcp.f32 %v846_v36  ;;  %v848_v40 = vadd.f32 1.0, %v2325_v39  ;;  %v694_v41 = vadd.f32 %v693_v35, %v3164_v10  ;;  %v695_v42 = vpop.f32.mrb[10].mxu0 }
 0x1da   : > { %2338 = vrcp.f32 %v847_v27  ;;  %v849_v44 = vadd.f32 1.0, %v2327_v37  ;;  %v1924_v45 = vmul.f32 -1.442695, %v692_v29  ;;  %v696_v43 = vadd.f32 %v695_v42, %v3160_v8  ;;  %v697_v46 = vpop.f32.mrb[11].mxu0 }
 0x1db   : > { %2340 = vrcp.f32 %v848_v40  ;;  %v1925_v47 = vmul.f32 -1.442695, %v694_v41  ;;  %v698_v48 = vadd.f32 %v697_v46, %v3164_v10 }
 0x1dc   : > { %2342 = vrcp.f32 %v849_v44  ;;  %v1926_v49 = vmul.f32 -1.442695, %v696_v43 }
 0x1dd   : > { %2344 = vpow2.f32 %v1924_v45  ;;  %v1927_v50 = vmul.f32 -1.442695, %v698_v48 }
 0x1de   : > { %v2329_v51 = vpop.eup %2328  ;;  %2346 = vpow2.f32 %v1925_v47 }
 0x1df   : > { %v2331_v52 = vpop.eup %2330  ;;  %v850_v53 = vadd.f32 1.0, %v2329_v51  ;;  %2348 = vpow2.f32 %v1926_v49  ;;  %v701_v54 = vpop.f32.mrb[12].mxu0 }
 0x1e0   : > { %v2333_v55 = vpop.eup %2332  ;;  %v851_v57 = vadd.f32 1.0, %v2331_v52  ;;  %2350 = vpow2.f32 %v1927_v50  ;;  %v702_v58 = vadd.f32 %v701_v54, %v3160_v8  ;;  %v703_v59 = vpop.f32.mrb[13].mxu0 }
 0x1e1   : > { %v2335_v60 = vpop.eup %2334  ;;  %2352 = vrcp.f32 %v850_v53  ;;  %v852_v61 = vadd.f32 1.0, %v2333_v55  ;;  %v704_v63 = vadd.f32 %v703_v59, %v3164_v10  ;;  %v705_v1 = vpop.f32.mrb[14].mxu0 }
 0x1e2   : > { %2354 = vrcp.f32 %v851_v57  ;;  %v853_v56 = vadd.f32 1.0, %v2335_v60  ;;  %v1928_v2 = vmul.f32 -1.442695, %v702_v58  ;;  %v706_v5 = vadd.f32 %v705_v1, %v3160_v8  ;;  %v707_v11 = vpop.f32.mrb[15].mxu0 }
 0x1e3   : > { %v2337_v12 = vpop.eup %2336  ;;  %2356 = vrcp.f32 %v852_v61  ;;  %v1929_v14 = vmul.f32 -1.442695, %v704_v63  ;;  %v708_v16 = vadd.f32 %v707_v11, %v3164_v10 }
 0x1e4   : > { %v2339_v17 = vpop.eup %2338  ;;  %2358 = vrcp.f32 %v853_v56  ;;  %v1930_v18 = vmul.f32 -1.442695, %v706_v5 }
 0x1e5   : > { %v2341_v62 = vpop.eup %2340  ;;  %2360 = vpow2.f32 %v1928_v2  ;;  %v1931_v19 = vmul.f32 -1.442695, %v708_v16 }
 0x1e6   : > { %v2343_v20 = vpop.eup %2342  ;;  %2362 = vpow2.f32 %v1929_v14  ;;  %v942_v0 = vpack.c.bf16 %v2341_v62, %v2337_v12 }
 0x1e7   : > { %v2345_v7 = vpop.eup %2344  ;;  %2364 = vpow2.f32 %v1930_v18  ;;  %v711_v22 = vpop.f32.mrb[16].mxu0  ;;  %v943_v9 = vpack.c.bf16 %v2343_v20, %v2339_v17 }
 0x1e8   : > { %v2347_v24 = vpop.eup %2346  ;;  %v854_v25 = vadd.f32 1.0, %v2345_v7  ;;  %2366 = vpow2.f32 %v1931_v19  ;;  %v712_v26 = vadd.f32 %v711_v22, %v3160_v8  ;;  %v713_v28 = vpop.f32.mrb[17].mxu0 }
 0x1e9   : > { %v2349_v30 = vpop.eup %2348  ;;  %v855_v13 = vadd.f32 1.0, %v2347_v24  ;;  %v714_v15 = vadd.f32 %v713_v28, %v3164_v10  ;;  %v715_v31 = vpop.f32.mrb[18].mxu0  ;;  %1535 = vmatprep.mubr.bf16.mxu0 %v943_v9 }
 0x1ea   : > { %v2351_v21 = vpop.eup %2350  ;;  %2368 = vrcp.f32 %v854_v25  ;;  %v856_v32 = vadd.f32 1.0, %v2349_v30  ;;  %v1932_v33 = vmul.f32 -1.442695, %v712_v26  ;;  %v716_v23 = vadd.f32 %v715_v31, %v3160_v8  ;;  %v717_v34 = vpop.f32.mrb[19].mxu0  ;;  %1536 = vmatmul.mubr.bf16.vlgmr.msra.gmra.mrb[32].mxu0 %v942_v0 }
 0x1eb   : > { %v2353_v36 = vpop.eup %2352  ;;  %2370 = vrcp.f32 %v855_v13  ;;  %v857_v38 = vadd.f32 1.0, %v2351_v21  ;;  %v1933_v39 = vmul.f32 -1.442695, %v714_v15  ;;  %v718_v27 = vadd.f32 %v717_v34, %v3164_v10 }
 0x1ec   : > { %v2355_v29 = vpop.eup %2354  ;;  %2372 = vrcp.f32 %v856_v32  ;;  %v1934_v35 = vmul.f32 -1.442695, %v716_v23 }
 0x1ed   : > { %v2357_v37 = vpop.eup %2356  ;;  %2374 = vrcp.f32 %v857_v38  ;;  %v1935_v40 = vmul.f32 -1.442695, %v718_v27 }
 0x1ee   : > { %v2359_v41 = vpop.eup %2358  ;;  %2376 = vpow2.f32 %v1932_v33  ;;  %v944_v42 = vpack.c.bf16 %v2357_v37, %v2353_v36 }
 0x1ef   : > { %v2361_v44 = vpop.eup %2360  ;;  %2378 = vpow2.f32 %v1933_v39  ;;  %v721_v45 = vpop.f32.mrb[20].mxu0  ;;  %v945_v43 = vpack.c.bf16 %v2359_v41, %v2355_v29 }
 0x1f0   : > { %v2363_v46 = vpop.eup %2362  ;;  %v858_v47 = vadd.f32 1.0, %v2361_v44  ;;  %2380 = vpow2.f32 %v1934_v35  ;;  %v722_v48 = vadd.f32 %v721_v45, %v3160_v8  ;;  %v723_v49 = vpop.f32.mrb[21].mxu0 }
 0x1f1   : > { %v2365_v50 = vpop.eup %2364  ;;  %v859_v51 = vadd.f32 1.0, %v2363_v46  ;;  %2382 = vpow2.f32 %v1935_v40  ;;  %v724_v52 = vadd.f32 %v723_v49, %v3164_v10  ;;  %v725_v53 = vpop.f32.mrb[22].mxu0  ;;  %1545 = vmatprep.mubr.bf16.mxu0 %v945_v43 }
 0x1f2   : > { %v2367_v54 = vpop.eup %2366  ;;  %2384 = vrcp.f32 %v858_v47  ;;  %v860_v55 = vadd.f32 1.0, %v2365_v50  ;;  %v1936_v57 = vmul.f32 -1.442695, %v722_v48  ;;  %v726_v58 = vadd.f32 %v725_v53, %v3160_v8  ;;  %v727_v59 = vpop.f32.mrb[23].mxu0  ;;  %1546 = vmatmul.mubr.bf16.gmra.mrb[36].mxu0 %v944_v42 }
 0x1f3   : > { %2386 = vrcp.f32 %v859_v51  ;;  %v861_v60 = vadd.f32 1.0, %v2367_v54  ;;  %v1937_v61 = vmul.f32 -1.442695, %v724_v52  ;;  %v728_v63 = vadd.f32 %v727_v59, %v3164_v10 }
 0x1f4   : > { %v2369_v1 = vpop.eup %2368  ;;  %2388 = vrcp.f32 %v860_v55  ;;  %v1938_v56 = vmul.f32 -1.442695, %v726_v58 }
 0x1f5   : > { %v2371_v2 = vpop.eup %2370  ;;  %2390 = vrcp.f32 %v861_v60  ;;  %v1939_v5 = vmul.f32 -1.442695, %v728_v63 }
 0x1f6   : > { %v2373_v11 = vpop.eup %2372  ;;  %2392 = vpow2.f32 %v1936_v57 }
 0x1f7   : > { %v2375_v12 = vpop.eup %2374  ;;  %2394 = vpow2.f32 %v1937_v61  ;;  %v731_v14 = vpop.f32.mrb[24].mxu0  ;;  %v946_v16 = vpack.c.bf16 %v2373_v11, %v2369_v1 }
 0x1f8   : > { %v2377_v17 = vpop.eup %2376  ;;  %2396 = vpow2.f32 %v1938_v56  ;;  %v732_v18 = vadd.f32 %v731_v14, %v3160_v8  ;;  %v733_v62 = vpop.f32.mrb[25].mxu0  ;;  %v947_v19 = vpack.c.bf16 %v2375_v12, %v2371_v2 }
 0x1f9   : > { %v2379_v20 = vpop.eup %2378  ;;  %v862_v0 = vadd.f32 1.0, %v2377_v17  ;;  %2398 = vpow2.f32 %v1939_v5  ;;  %v734_v7 = vadd.f32 %v733_v62, %v3164_v10  ;;  %v735_v22 = vpop.f32.mrb[26].mxu0 }
 0x1fa   : > { %v2381_v9 = vpop.eup %2380  ;;  %v863_v24 = vadd.f32 1.0, %v2379_v20  ;;  %v736_v25 = vadd.f32 %v735_v22, %v3160_v8  ;;  %1555 = vmatprep.mubr.bf16.mxu0 %v947_v19  ;;  %v737_v26 = vpop.f32.mrb[27].mxu0  ;;  %v1940_v13 = vmul.f32 -1.442695, %v732_v18 }
 0x1fb   : > { %v2383_v28 = vpop.eup %2382  ;;  %2400 = vrcp.f32 %v862_v0  ;;  %v864_v30 = vadd.f32 1.0, %v2381_v9  ;;  %v738_v15 = vadd.f32 %v737_v26, %v3164_v10  ;;  %1556 = vmatmul.mubr.bf16.gmra.mrb[40].mxu0 %v946_v16  ;;  %v1941_v32 = vmul.f32 -1.442695, %v734_v7 }
 0x1fc   : > { %v2385_v31 = vpop.eup %2384  ;;  %2402 = vrcp.f32 %v863_v24  ;;  %v865_v21 = vadd.f32 1.0, %v2383_v28  ;;  %v1942_v23 = vmul.f32 -1.442695, %v736_v25 }
 0x1fd   : > { %v2387_v33 = vpop.eup %2386  ;;  %2404 = vrcp.f32 %v864_v30  ;;  %v1943_v36 = vmul.f32 -1.442695, %v738_v15 }
 0x1fe   : > { %v2389_v34 = vpop.eup %2388  ;;  %2406 = vrcp.f32 %v865_v21 }
 0x1ff   : > { %v2391_v38 = vpop.eup %2390  ;;  %2408 = vpow2.f32 %v1940_v13  ;;  %v741_v39 = vpop.f32.mrb[28].mxu0  ;;  %v948_v27 = vpack.c.bf16 %v2389_v34, %v2385_v31 }
 0x200   : > { %v2393_v29 = vpop.eup %2392  ;;  %2410 = vpow2.f32 %v1941_v32  ;;  %v742_v35 = vadd.f32 %v741_v39, %v3160_v8  ;;  %v743_v37 = vpop.f32.mrb[29].mxu0  ;;  %v949_v40 = vpack.c.bf16 %v2391_v38, %v2387_v33 }
 0x201   : > { %v2395_v41 = vpop.eup %2394  ;;  %v866_v42 = vadd.f32 1.0, %v2393_v29  ;;  %2412 = vpow2.f32 %v1942_v23  ;;  %v744_v44 = vadd.f32 %v743_v37, %v3164_v10  ;;  %v745_v45 = vpop.f32.mrb[30].mxu0 }
 0x202   : > { %v2397_v43 = vpop.eup %2396  ;;  %v867_v46 = vadd.f32 1.0, %v2395_v41  ;;  %2414 = vpow2.f32 %v1943_v36  ;;  %v746_v47 = vadd.f32 %v745_v45, %v3160_v8  ;;  %1565 = vmatprep.mubr.bf16.mxu0 %v949_v40  ;;  %v747_v48 = vpop.f32.mrb[31].mxu0  ;;  %v1944_v51 = vmul.f32 -1.442695, %v742_v35 }
 0x203   : > { %v2399_v49 = vpop.eup %2398  ;;  %2416 = vrcp.f32 %v866_v42  ;;  %v868_v50 = vadd.f32 1.0, %v2397_v43  ;;  %v748_v52 = vadd.f32 %v747_v48, %v3164_v10  ;;  %1566 = vmatmul.mubr.bf16.gmra.mrb[44].mxu0 %v948_v27  ;;  %v1945_v54 = vmul.f32 -1.442695, %v744_v44  ;;  %v1264_v33 = vpop.f32.mrb[0].mxu1 }
 0x204   : > { %2418 = vrcp.f32 %v867_v46  ;;  %v869_v53 = vadd.f32 1.0, %v2399_v49  ;;  %v1946_v57 = vmul.f32 -1.442695, %v746_v47  ;;  %v1266_v23 = vpop.f32.mrb[1].mxu1 }
 0x205   : > { %v2401_v55 = vpop.eup %2400  ;;  %2420 = vrcp.f32 %v868_v50  ;;  %v1947_v59 = vmul.f32 -1.442695, %v748_v52  ;;  %v1268_v34 = vpop.f32.mrb[2].mxu1  ;;  %v1616_v52 = vld [vmem:[%s3345_s6] sm:$0x3] }
 0x206   : > { %v2403_v58 = vpop.eup %2402  ;;  %2422 = vrcp.f32 %v869_v53  ;;  %v1270_v36 = vpop.f32.mrb[3].mxu1  ;;  %v3211_v53 = vrot.slane %v1616_v52, %v469_v4 }
 0x207   : > { %v2405_v60 = vpop.eup %2404  ;;  %2424 = vpow2.f32 %v1944_v51  ;;  %v1274_v40 = vpop.f32.mrb[4].mxu1 }
 0x208   : > { %v2407_v8 = vpop.eup %2406  ;;  %2426 = vpow2.f32 %v1945_v54  ;;  %v950_v61 = vpack.c.bf16 %v2405_v60, %v2401_v55  ;;  %v1276_v41 = vpop.f32.mrb[5].mxu1  ;;  %v3215_v55 = vrot.slane %v1616_v52, %v473_v6 }
 0x209   : > { %v2409_v63 = vpop.eup %2408  ;;  %2428 = vpow2.f32 %v1946_v57  ;;  %v951_v1 = vpack.c.bf16 %v2407_v8, %v2403_v58  ;;  %v1278_v42 = vpop.f32.mrb[6].mxu1 }
 0x20a   : > { %v2411_v56 = vpop.eup %2410  ;;  %v870_v10 = vadd.f32 1.0, %v2409_v63  ;;  %2430 = vpow2.f32 %v1947_v59  ;;  %v1280_v44 = vpop.f32.mrb[7].mxu1 }
 0x20b   : > { %v2413_v2 = vpop.eup %2412  ;;  %v871_v5 = vadd.f32 1.0, %v2411_v56  ;;  %1575 = vmatprep.mubr.bf16.mxu1 %v951_v1  ;;  %v1284_v45 = vpop.f32.mrb[8].mxu1 }
 0x20c   : > { %v2415_v11 = vpop.eup %2414  ;;  %2432 = vrcp.f32 %v870_v10  ;;  %v872_v12 = vadd.f32 1.0, %v2413_v2  ;;  %1576 = vmatmul.mubr.bf16.vlgmr.msra.gmra.mrb[16].mxu1 %v950_v61  ;;  %v1286_v43 = vpop.f32.mrb[9].mxu1 }
 0x20d   : > { %v2417_v14 = vpop.eup %2416  ;;  %2434 = vrcp.f32 %v871_v5  ;;  %v873_v16 = vadd.f32 1.0, %v2415_v11  ;;  %v1288_v46 = vpop.f32.mrb[10].mxu1 }
 0x20e   : > { %v2419_v17 = vpop.eup %2418  ;;  %2436 = vrcp.f32 %v872_v12  ;;  %v1290_v47 = vpop.f32.mrb[11].mxu1 }
 0x20f   : > { %v2421_v18 = vpop.eup %2420  ;;  %2438 = vrcp.f32 %v873_v16  ;;  %v3198_v48 = vpop.f32.mrb[12].mxu1 }
 0x210   : > { %v2423_v62 = vpop.eup %2422  ;;  %v952_v19 = vpack.c.bf16 %v2421_v18, %v2417_v14  ;;  %v3200_v49 = vpop.f32.mrb[13].mxu1 }
 0x211   : > { %v2425_v20 = vpop.eup %2424  ;;  %v953_v0 = vpack.c.bf16 %v2423_v62, %v2419_v17  ;;  %v3202_v50 = vpop.f32.mrb[14].mxu1 }
 0x212   : > { %v2427_v7 = vpop.eup %2426  ;;  %v874_v22 = vadd.f32 1.0, %v2425_v20  ;;  %v3204_v51 = vpop.f32.mrb[15].mxu1 }
 0x213   : > { %v2429_v9 = vpop.eup %2428  ;;  %v875_v24 = vadd.f32 1.0, %v2427_v7  ;;  %1585 = vmatprep.mubr.bf16.mxu1 %v953_v0 }
 0x214   : > { %v2431_v25 = vpop.eup %2430  ;;  %2440 = vrcp.f32 %v874_v22  ;;  %v876_v26 = vadd.f32 1.0, %v2429_v9  ;;  %1586 = vmatmul.mubr.bf16.gmra.mrb[20].mxu1 %v952_v19 }
 0x215   : > { %2442 = vrcp.f32 %v875_v24  ;;  %v877_v28 = vadd.f32 1.0, %v2431_v25 }
 0x216   : > { %v2433_v30 = vpop.eup %2432  ;;  %2444 = vrcp.f32 %v876_v26 }
 0x217   : > { %v2435_v13 = vpop.eup %2434  ;;  %2446 = vrcp.f32 %v877_v28 }
 0x218   : > { %v2437_v15 = vpop.eup %2436 }
 0x219   : > { %v2439_v31 = vpop.eup %2438  ;;  %v954_v21 = vpack.c.bf16 %v2437_v15, %v2433_v30 }
 0x21a   : > { %v955_v32 = vpack.c.bf16 %v2439_v31, %v2435_v13 }
 0x21c   : > { %1595 = vmatprep.mubr.bf16.mxu1 %v955_v32 }
 0x21d   : > { %1596 = vmatmul.mubr.bf16.gmra.mrb[24].mxu1 %v954_v21 }
 0x21e   : > { %v2441_v38 = vpop.eup %2440 }
 0x21f   : > { %v2443_v39 = vpop.eup %2442 }
 0x220   : > { %v2445_v27 = vpop.eup %2444 }
 0x221   : > { %v2447_v29 = vpop.eup %2446  ;;  %v956_v35 = vpack.c.bf16 %v2445_v27, %v2441_v38 }
 0x222   : > { %v957_v37 = vpack.c.bf16 %v2447_v29, %v2443_v39 }
 0x224   : > { %1605 = vmatprep.mubr.bf16.mxu1 %v957_v37 }
 0x225   : > { %1606 = vmatmul.mubr.bf16.gmra.mrb[28].mxu1 %v956_v35 }
 0x2bd   : > { %v1537_v54 = vpop.f32.mrb[32].mxu0 }
 0x2be   : > { %v1538_v57 = vadd.f32 %v1537_v54, %v1264_v33  ;;  %v1539_v58 = vpop.f32.mrb[33].mxu0 }
 0x2bf   : > { %v1540_v59 = vadd.f32 %v1539_v58, %v1266_v23  ;;  %v1541_v60 = vpop.f32.mrb[34].mxu0 }
 0x2c0   : > { %v1628_v8 = vadd.f32 %v3211_v53, %v1538_v57  ;;  %v1542_v61 = vadd.f32 %v1541_v60, %v1268_v34  ;;  %v1543_v63 = vpop.f32.mrb[35].mxu0 }
 0x2c1   : > { %v1629_v1 = vadd.f32 %v3215_v55, %v1540_v59  ;;  %v1544_v56 = vadd.f32 %v1543_v63, %v1270_v36 }
 0x2c2   : > { %v1660_v10 = vmax.f32 %v1628_v8, 0.0  ;;  %v1630_v4 = vadd.f32 %v3211_v53, %v1542_v61 }
 0x2c3   : > { %v1661_v2 = vmax.f32 %v1629_v1, 0.0  ;;  %v1631_v5 = vadd.f32 %v3215_v55, %v1544_v56 }
 0x2c4   : > { %1692 = vst [vmem:[%s3222_s10] sm:$0xff] %v1660_v10  ;;  %v1662_v3 = vmax.f32 %v1630_v4, 0.0 }
 0x2c5   : > { %1693 = vst [vmem:[%s3222_s10 + $0x8] sm:$0xff] %v1661_v2  ;;  %v1663_v6 = vmax.f32 %v1631_v5, 0.0  ;;  %v1547_v11 = vpop.f32.mrb[36].mxu0 }
 0x2c6   : > { %1694 = vst [vmem:[%s3222_s10 + $0x10] sm:$0xff] %v1662_v3  ;;  %v1548_v12 = vadd.f32 %v1547_v11, %v1274_v40  ;;  %v1549_v14 = vpop.f32.mrb[37].mxu0 }
 0x2c7   : > { %1695 = vst [vmem:[%s3222_s10 + $0x18] sm:$0xff] %v1663_v6  ;;  %v1550_v16 = vadd.f32 %v1549_v14, %v1276_v41  ;;  %v1551_v17 = vpop.f32.mrb[38].mxu0 }
 0x2c8   : > { %v1632_v18 = vadd.f32 %v3211_v53, %v1548_v12  ;;  %v1552_v62 = vadd.f32 %v1551_v17, %v1278_v42  ;;  %v1553_v19 = vpop.f32.mrb[39].mxu0 }
 0x2c9   : > { %v1633_v20 = vadd.f32 %v3215_v55, %v1550_v16  ;;  %v1554_v0 = vadd.f32 %v1553_v19, %v1280_v44 }
 0x2ca   : > { %v1664_v7 = vmax.f32 %v1632_v18, 0.0  ;;  %v1634_v22 = vadd.f32 %v3211_v53, %v1552_v62 }
 0x2cb   : > { %v1665_v9 = vmax.f32 %v1633_v20, 0.0  ;;  %v1635_v24 = vadd.f32 %v3215_v55, %v1554_v0 }
 0x2cc   : > { %1696 = vst [vmem:[%s3222_s10 + $0x20] sm:$0xff] %v1664_v7  ;;  %v1666_v25 = vmax.f32 %v1634_v22, 0.0 }
 0x2cd   : > { %1697 = vst [vmem:[%s3222_s10 + $0x28] sm:$0xff] %v1665_v9  ;;  %v1667_v26 = vmax.f32 %v1635_v24, 0.0 }
 0x2ce   : > { %1698 = vst [vmem:[%s3222_s10 + $0x30] sm:$0xff] %v1666_v25  ;;  %v1557_v28 = vpop.f32.mrb[40].mxu0 }
 0x2cf   : > { %1699 = vst [vmem:[%s3222_s10 + $0x38] sm:$0xff] %v1667_v26  ;;  %v1558_v30 = vadd.f32 %v1557_v28, %v1284_v45  ;;  %v1559_v13 = vpop.f32.mrb[41].mxu0 }
 0x2d0   : > { %v1560_v15 = vadd.f32 %v1559_v13, %v1286_v43  ;;  %v1561_v31 = vpop.f32.mrb[42].mxu0 }
 0x2d1   : > { %v1636_v21 = vadd.f32 %v3211_v53, %v1558_v30  ;;  %v1562_v32 = vadd.f32 %v1561_v31, %v1288_v46  ;;  %v1563_v33 = vpop.f32.mrb[43].mxu0 }
 0x2d2   : > { %v1637_v23 = vadd.f32 %v3215_v55, %v1560_v15  ;;  %v1564_v34 = vadd.f32 %v1563_v33, %v1290_v47 }
 0x2d3   : > { %v1668_v36 = vmax.f32 %v1636_v21, 0.0  ;;  %v1638_v38 = vadd.f32 %v3211_v53, %v1562_v32 }
 0x2d4   : > { %v1669_v39 = vmax.f32 %v1637_v23, 0.0  ;;  %v1639_v27 = vadd.f32 %v3215_v55, %v1564_v34 }
 0x2d5   : > { %1700 = vst [vmem:[%s3222_s10 + $0x40] sm:$0xff] %v1668_v36  ;;  %v1670_v29 = vmax.f32 %v1638_v38, 0.0 }
 0x2d6   : > { %1701 = vst [vmem:[%s3222_s10 + $0x48] sm:$0xff] %v1669_v39  ;;  %v1671_v35 = vmax.f32 %v1639_v27, 0.0  ;;  %v1567_v37 = vpop.f32.mrb[44].mxu0 }
 0x2d7   : > { %1702 = vst [vmem:[%s3222_s10 + $0x50] sm:$0xff] %v1670_v29  ;;  %v1568_v40 = vadd.f32 %v1567_v37, %v3198_v48  ;;  %v1569_v41 = vpop.f32.mrb[45].mxu0 }
 0x2d8   : > { %1703 = vst [vmem:[%s3222_s10 + $0x58] sm:$0xff] %v1671_v35  ;;  %v1570_v42 = vadd.f32 %v1569_v41, %v3200_v49  ;;  %v1571_v44 = vpop.f32.mrb[46].mxu0 }
 0x2d9   : > { %v1640_v45 = vadd.f32 %v3211_v53, %v1568_v40  ;;  %v1572_v43 = vadd.f32 %v1571_v44, %v3202_v50  ;;  %v1573_v46 = vpop.f32.mrb[47].mxu0 }
 0x2da   : > { %v1641_v47 = vadd.f32 %v3215_v55, %v1570_v42  ;;  %v1574_v52 = vadd.f32 %v1573_v46, %v3204_v51 }
 0x2db   : > { %v1672_v54 = vmax.f32 %v1640_v45, 0.0  ;;  %v1642_v48 = vadd.f32 %v3211_v53, %v1572_v43 }
 0x2dc   : > { %v1673_v57 = vmax.f32 %v1641_v47, 0.0  ;;  %v1643_v58 = vadd.f32 %v3215_v55, %v1574_v52 }
 0x2dd   : > { %1704 = vst [vmem:[%s3222_s10 + $0x60] sm:$0xff] %v1672_v54  ;;  %v1674_v49 = vmax.f32 %v1642_v48, 0.0 }
 0x2de   : > { %1705 = vst [vmem:[%s3222_s10 + $0x68] sm:$0xff] %v1673_v57  ;;  %v1675_v59 = vmax.f32 %v1643_v58, 0.0 }
 0x2df   : > { %1706 = vst [vmem:[%s3222_s10 + $0x70] sm:$0xff] %v1674_v49  ;;  %v1577_v50 = vpop.f32.mrb[16].mxu1 }
 0x2e0   : > { %1707 = vst [vmem:[%s3222_s10 + $0x78] sm:$0xff] %v1675_v59  ;;  %v1644_v60 = vadd.f32 %v3211_v53, %v1577_v50  ;;  %v1579_v51 = vpop.f32.mrb[17].mxu1 }
 0x2e1   : > { %v1645_v8 = vadd.f32 %v3215_v55, %v1579_v51  ;;  %v1581_v61 = vpop.f32.mrb[18].mxu1 }
 0x2e2   : > { %v1676_v63 = vmax.f32 %v1644_v60, 0.0  ;;  %v1646_v1 = vadd.f32 %v3211_v53, %v1581_v61  ;;  %v1583_v56 = vpop.f32.mrb[19].mxu1 }
 0x2e3   : > { %v1677_v10 = vmax.f32 %v1645_v8, 0.0  ;;  %v1647_v4 = vadd.f32 %v3215_v55, %v1583_v56 }
 0x2e4   : > { %1708 = vst [vmem:[%s3222_s10 + $0x80] sm:$0xff] %v1676_v63  ;;  %v1678_v2 = vmax.f32 %v1646_v1, 0.0 }
 0x2e5   : > { %1709 = vst [vmem:[%s3222_s10 + $0x88] sm:$0xff] %v1677_v10  ;;  %v1679_v5 = vmax.f32 %v1647_v4, 0.0 }
 0x2e6   : > { %1710 = vst [vmem:[%s3222_s10 + $0x90] sm:$0xff] %v1678_v2 }
 0x2e7   : > { %1711 = vst [vmem:[%s3222_s10 + $0x98] sm:$0xff] %v1679_v5  ;;  %v1587_v3 = vpop.f32.mrb[20].mxu1 }
 0x2e8   : > { %v1648_v6 = vadd.f32 %v3211_v53, %v1587_v3  ;;  %v1589_v11 = vpop.f32.mrb[21].mxu1 }
 0x2e9   : > { %v1649_v12 = vadd.f32 %v3215_v55, %v1589_v11  ;;  %v1591_v14 = vpop.f32.mrb[22].mxu1 }
 0x2ea   : > { %v1680_v16 = vmax.f32 %v1648_v6, 0.0  ;;  %v1650_v17 = vadd.f32 %v3211_v53, %v1591_v14  ;;  %v1593_v18 = vpop.f32.mrb[23].mxu1 }
 0x2eb   : > { %v1681_v62 = vmax.f32 %v1649_v12, 0.0  ;;  %v1651_v19 = vadd.f32 %v3215_v55, %v1593_v18 }
 0x2ec   : > { %1712 = vst [vmem:[%s3222_s10 + $0xa0] sm:$0xff] %v1680_v16  ;;  %v1682_v20 = vmax.f32 %v1650_v17, 0.0 }
 0x2ed   : > { %1713 = vst [vmem:[%s3222_s10 + $0xa8] sm:$0xff] %v1681_v62  ;;  %v1683_v0 = vmax.f32 %v1651_v19, 0.0 }
 0x2ee   : > { %1714 = vst [vmem:[%s3222_s10 + $0xb0] sm:$0xff] %v1682_v20 }
 0x2ef   : > { %1715 = vst [vmem:[%s3222_s10 + $0xb8] sm:$0xff] %v1683_v0 }
 0x2f0   : > { %v1597_v7 = vpop.f32.mrb[24].mxu1 }
 0x2f1   : > { %v1652_v22 = vadd.f32 %v3211_v53, %v1597_v7  ;;  %v1599_v9 = vpop.f32.mrb[25].mxu1 }
 0x2f2   : > { %v1653_v24 = vadd.f32 %v3215_v55, %v1599_v9  ;;  %v1601_v25 = vpop.f32.mrb[26].mxu1 }
 0x2f3   : > { %v1684_v26 = vmax.f32 %v1652_v22, 0.0  ;;  %v1654_v28 = vadd.f32 %v3211_v53, %v1601_v25  ;;  %v1603_v30 = vpop.f32.mrb[27].mxu1 }
 0x2f4   : > { %v1685_v13 = vmax.f32 %v1653_v24, 0.0  ;;  %v1655_v15 = vadd.f32 %v3215_v55, %v1603_v30 }
 0x2f5   : > { %1716 = vst [vmem:[%s3222_s10 + $0xc0] sm:$0xff] %v1684_v26  ;;  %v1686_v31 = vmax.f32 %v1654_v28, 0.0 }
 0x2f6   : > { %1717 = vst [vmem:[%s3222_s10 + $0xc8] sm:$0xff] %v1685_v13  ;;  %v1687_v21 = vmax.f32 %v1655_v15, 0.0 }
 0x2f7   : > { %1718 = vst [vmem:[%s3222_s10 + $0xd0] sm:$0xff] %v1686_v31 }
 0x2f8   : > { %1719 = vst [vmem:[%s3222_s10 + $0xd8] sm:$0xff] %v1687_v21  ;;  %v1607_v32 = vpop.f32.mrb[28].mxu1 }
 0x2f9   : > { %v1656_v33 = vadd.f32 %v3211_v53, %v1607_v32  ;;  %v1609_v23 = vpop.f32.mrb[29].mxu1 }
 0x2fa   : > { %v1657_v34 = vadd.f32 %v3215_v55, %v1609_v23  ;;  %v1611_v36 = vpop.f32.mrb[30].mxu1 }
 0x2fb   : > { %v1688_v38 = vmax.f32 %v1656_v33, 0.0  ;;  %v1658_v39 = vadd.f32 %v3211_v53, %v1611_v36  ;;  %v1613_v27 = vpop.f32.mrb[31].mxu1 }
 0x2fc   : > { %v1689_v29 = vmax.f32 %v1657_v34, 0.0  ;;  %v1659_v35 = vadd.f32 %v3215_v55, %v1613_v27 }
 0x2fd   : > { %1720 = vst [vmem:[%s3222_s10 + $0xe0] sm:$0xff] %v1688_v38  ;;  %v1690_v37 = vmax.f32 %v1658_v39, 0.0 }
 0x2fe   : > { %1721 = vst [vmem:[%s3222_s10 + $0xe8] sm:$0xff] %v1689_v29  ;;  %v1691_v40 = vmax.f32 %v1659_v35, 0.0 }
 0x2ff   : > { %1722 = vst [vmem:[%s3222_s10 + $0xf0] sm:$0xff] %v1690_v37 }
 0x300   : > { %1723 = vst [vmem:[%s3222_s10 + $0xf8] sm:$0xff] %v1691_v40 }
 0x301   : > { %2605 = shalt.err (!%p2602_p3)
}
 0x302   : > { %s2606_s2 = scalar_lea.hbm %s3290_s20, 4096  ;;  %s2610_s30 = scalar_lea.hbm %s3346_s7, 8192 }
 0x303   : > { %p2607_p9 = scmp.ne.s32.totalorder %s3290_s20, %s2606_s2  ;;  %p2611_p7 = scmp.lt.u32.totalorder %s3290_s20, %s3346_s7 }
 0x304   : > { %p2612_p12 = scmp.lt.u32.totalorder %s2610_s30, %s2606_s2  ;;  %p2614_p2 = scmp.lt.u32.totalorder %s2606_s2, %s3290_s20 }
 0x305   : > { %p2608_p13 = pnand %p2607_p9, %p2878_p5 }
 0x306   : > { %p2613_p1 = por %p2612_p12, %p2611_p7 }
 0x307   : > { %p2609_p11 = pneg %p2608_p13 }
 0x308   : > { %p2615_p4 = por %p2614_p2, %p2613_p1 }
 0x30a   : > { %p2616_p0 = pnand %p2615_p4, %p2609_p11 }
 0x30c   : > { %2619 = shalt.err (!%p2616_p0)
}
 0x30d   : > { %s2682_s15 = smov 256   ;;  %s2683_s10 = smov 16  }
 0x30e   : > { %2104 = dma.vmem_to_hbm [thread:$0]  (%p2878_p5), %s3292_s29, 4096, %s3290_s20, %s1725_s28, %s2682_s15, %s2682_s15, %s2683_s10  }
 0x30f PF: > { %s3372_s14 = sld [smem:[#allocation17_spill]]  ;;  %s1754_s0 = sand.u32 1, %s2658_s24  }
 0x310   : > { %p3374_p6 = scmp.ge.s32.totalorder %s2670_s27, 2  ;;  %s1755_s16 = scalar_lea.sflag [#allocation4], %s1754_s0 }
 0x315   : > { %p3373_p8 = scmp.ne.s32.totalorder %s3372_s14, 0 }
 0x317   : > { %p2124_p10 = pnand %p3374_p6, %p3373_p8 }
 0x319   : > { %2653 = dma.done.wait (!%p2124_p10), %s1755_s16, 4096  }
 0x31a   : > { %2655 = vsyncadd (!%p2124_p10), %s1755_s16, 4294963200  ;;  %p24_p3 = scmp.ge.s32.totalorder %s2864_s12, 4   ;;  %s3375_s24 = smov %s2662_s25 }
 0x31b   : > { %s3376_s25 = smov %s2666_s26  ;;  %s3377_s26 = smov %s2874_s18 }
 0x31c   : > { %s3378_s27 = smov %s2864_s12  ;;  %26 = sbr.rel (!%p24_p3) target bundleno = 12 (0xc), region = 118 }
 0x323   :  { %1760 = vsyncpa [#allocation3], 1 }
 0x324   :  { %1762 = vsyncpa [#allocation3 + $0x1], 1 }
 0x325   :  { %1763 = vsyncpa [#allocation6], 1 }
 0x326   :  { %1765 = vsyncpa [#allocation6 + $0x1], 1 }
 0x327   :  { %1766 = vsyncpa [#allocation9], 1 }
 0x328   :  { %1767 = vsyncpa [#allocation4], 1 }
 0x329   :  { %1769 = vsyncpa [#allocation4 + $0x1], 1 }

</bundles_post_ra>
